<compile_context>
chip_gen: v7x
topology: tpu7x:2x2x1
jax: 0.10.0
libtpu: 0.0.40
codegen_flags: <defaults>
</compile_context>

<pallas_src>
import math

import jax
import jax.numpy as jnp
from jax.experimental import pallas as pl
from jax.experimental.pallas import tpu as pltpu


def _round_up(x, m):
    return -(-x // m) * m


def _largest_divisor_leq(n, target):
    t = max(1, min(n, target))
    for d in range(t, 0, -1):
        if n % d == 0:
            return d
    return 1


def _device_defaults():
    """(vmem_limit_bytes, m_chunks) appropriate for the local TPU generation."""
    try:
        kind = jax.devices()[0].device_kind.lower()
    except Exception:
        kind = ""
    if "v7" in kind:
        # v7x: 64 MiB VMEM per TensorCore -> leave headroom; 2 TCs/chip -> shard M.
        return 56 * 1024 * 1024, 2
    # v5e/v6e (and v4/v5p): 128 MiB physical VMEM, single TensorCore per chip.
    return 100 * 1024 * 1024, 1


def make_dyn_kernel(*, M, TM, T, TB, n_pad, out_pad, decay, k, n,
                    matmul_dtype, rblock_dtype, drive_dtype, out_dtype,
                    vmem_limit_bytes, single_buffer_constants=True):
    """Recurrent Euler simulation with fused, per-time-block batched readout.

    Kernel inputs:
      drive  [T, M, n_pad]     eps @ (chol^T*sqrt(dt)) + (dt/tau)*(h@Win^T + b_in), zero-padded
      W_eff  [n_pad, n_pad]    W^T * dt/tau (zero-padded, matmul_dtype)
      WoutT  [n_pad, out_pad]  Wout^T (zero-padded, lane-dense, matmul_dtype)
      b_out  [1, out_pad]      zero-padded bias (f32)
      u0     [M, n_pad]        initial state (f32, padded rows/lanes are 0)
    Output: [T, M, out_pad] (out_dtype); the real readout lives in the first lanes.
    """
    Mc, Tc = M // TM, T // TB

    # n is a static Python int -> integer_pow on the 4-wide VALU (not the EUP pipe);
    # special-case n == 2 to a plain square.
    if isinstance(n, int) and n == 2:
        def f(u):
            r = jnp.maximum(u, 0.0)
            return k * r * r
    else:
        def f(u):
            return k * jnp.maximum(u, 0.0) ** n

    def kernel(drive_ref, weff_ref, woutT_ref, bout_ref, u0_ref, out_ref,
               u_state, r_state, r_block):
        # (Re-)initialize carried state at the start of each M-chunk's time sweep.
        @pl.when(pl.program_id(1) == 0)
        def _():
            u0 = u0_ref[...]
            u_state[...] = u0
            r_state[...] = f(u0).astype(r_state.dtype)

        weff = weff_ref[...]                    # hoisted constant MXU operand

        def step(s, carry):
            u, r = carry
            # recurrent drive uses the rates of the *previous* state
            rec = jnp.dot(r, weff, preferred_element_type=jnp.float32)
            # folded Euler step: u <- u*(1-dt/tau) + f(u)@(W^T dt/tau) + drive_t
            u = u * decay + rec + drive_ref[s].astype(jnp.float32)
            r32 = f(u)
            r_block[s] = r32.astype(r_block.dtype)
            return u, r32.astype(matmul_dtype)

        # (u, r) carried in registers across the unrolled steps; scratch written once
        # per time block instead of every step.
        u_fin, r_fin = jax.lax.fori_loop(0, TB, step,
                                         (u_state[...], r_state[...]),
                                         unroll=True)
        u_state[...] = u_fin
        r_state[...] = r_fin

        # Batched lane-dense readout: one (TB*TM, N) @ (N, out_pad) matmul per time
        # block, off the per-step recurrent dependency chain.  Bias added once per block.
        rb = r_block[...].reshape(TB * TM, n_pad).astype(matmul_dtype)
        out = jnp.dot(rb, woutT_ref[...], preferred_element_type=jnp.float32)
        out = out.reshape(TB, TM, out_pad) + bout_ref[...]
        out_ref[...] = out.astype(out_ref.dtype)
        # TODO(synk): when out_pad >> n_pad, skip this readout and emit r instead,
        # doing r @ Wout^T as one large XLA matmul in the wrapper (smaller writeback).

    def const_spec(shape, index_map):
        # Constant-index operands: single-buffer them; double-buffering only burns VMEM.
        if single_buffer_constants:
            return pl.BlockSpec(shape, index_map, pipeline_mode=pl.Buffered(1))
        return pl.BlockSpec(shape, index_map)

    grid_spec = pltpu.PrefetchScalarGridSpec(
        num_scalar_prefetch=0,
        grid=(Mc, Tc),                                               # (trial-chunks, time-blocks)
        in_specs=[
            # TODO(synk): raise to pl.Buffered(3) on v5e/v6e if profiling shows exposed drive DMA.
            pl.BlockSpec((TB, TM, n_pad), lambda m, t: (t, m, 0)),   # streamed drive
            const_spec((n_pad, n_pad),    lambda m, t: (0, 0)),      # W^T * dt/tau
            const_spec((n_pad, out_pad),  lambda m, t: (0, 0)),      # Wout^T (padded)
            const_spec((1, out_pad),      lambda m, t: (0, 0)),      # b_out  (padded)
            const_spec((TM, n_pad),       lambda m, t: (m, 0)),      # u0 chunk
        ],
        out_specs=pl.BlockSpec((TB, TM, out_pad), lambda m, t: (t, m, 0)),
        scratch_shapes=[pltpu.VMEM((TM, n_pad), jnp.float32),        # carried u
                        pltpu.VMEM((TM, n_pad), matmul_dtype),       # carried r = f(u)
                        pltpu.VMEM((TB, TM, n_pad), rblock_dtype)],  # per-block rates
    )

    mm_b = jnp.dtype(matmul_dtype).itemsize
    flops = T * M * (2 * n_pad * n_pad + 2 * n_pad * out_pad + 6 * n_pad)
    bytes_accessed = (T * M * n_pad * jnp.dtype(drive_dtype).itemsize
                      + T * M * out_pad * jnp.dtype(out_dtype).itemsize
                      + (n_pad * n_pad + n_pad * out_pad) * mm_b
                      + out_pad * 4 + M * n_pad * 4)

    return pl.pallas_call(
        kernel,
        grid_spec=grid_spec,
        out_shape=jax.ShapeDtypeStruct((T, M, out_pad), out_dtype),
        compiler_params=pltpu.CompilerParams(
            dimension_semantics=("parallel", "arbitrary"),
            vmem_limit_bytes=vmem_limit_bytes),
        cost_estimate=pl.CostEstimate(flops=flops, transcendentals=0,
                                      bytes_accessed=bytes_accessed),
    )


def dynamical_network_forward(params, h_sequence, *, trials, dt, tau, k, n, Sigma_xi, key,
                              time_block=None, m_chunks=None, matmul_dtype=jnp.float32,
                              drive_dtype=None, out_dtype=jnp.float32,
                              vmem_limit_bytes=None):
    """h_sequence: [batch, time, in_dim] -> output [batch, trials, time, out_dim]."""
    batch, time_steps, in_dim = h_sequence.shape
    neurons = params["W"].shape[0]
    out_dim = params["Wout"].shape[0]
    if drive_dtype is None:
        drive_dtype = matmul_dtype

    auto_vmem, auto_chunks = _device_defaults()
    if vmem_limit_bytes is None:
        vmem_limit_bytes = auto_vmem
    if m_chunks is None:
        m_chunks = auto_chunks

    M_real = trials * batch
    M = _round_up(M_real, 8)             # sublane-dense rows
    n_pad = _round_up(neurons, 128)      # lane-dense state / weights (padded neurons stay 0)
    out_pad = _round_up(out_dim, 128)    # lane-dense (unmasked) output stores

    # v7x dual-TensorCore sharding only when the chunked TM obeys the sublane constraint.
    if m_chunks > 1 and (M % m_chunks != 0 or (M // m_chunks) % 8 != 0):
        m_chunks = 1
    TM = M // m_chunks
    assert TM % 8 == 0, (TM, m_chunks)

    c = dt / tau
    sqrt_dt = math.sqrt(dt)

    # glue: cholesky (lower, as torch.cholesky) and noise pre-sampling
    chol = jnp.linalg.cholesky(Sigma_xi)
    k_u, k_eps = jax.random.split(key)
    u0 = jax.random.normal(k_u, (M_real, neurons), jnp.float32) * 0.1
    eps = jax.random.normal(k_eps, (time_steps, M_real, neurons), jnp.float32)

    # ---- hoisted projections (single large XLA matmuls outside the kernel) ----
    h_neural = h_sequence.astype(jnp.float32) @ params["Win"].T + params["b_in"]   # [B,T,N]
    h_scaled = jnp.transpose(h_neural, (1, 0, 2)) * c                              # [T,B,N]
    dxi = eps @ (chol.T * sqrt_dt)                                                 # [T,M,N]
    drive = dxi.reshape(time_steps, trials, batch, neurons) + h_scaled[:, None, :, :]
    drive = drive.reshape(time_steps, M_real, neurons)
    drive = jnp.pad(drive, ((0, 0), (0, M - M_real), (0, n_pad - neurons))).astype(drive_dtype)
    u0_k = jnp.pad(u0, ((0, M - M_real), (0, n_pad - neurons)))

    # folded weights (zero-padded, MXU dtype)
    W_eff = jnp.zeros((n_pad, n_pad), jnp.float32).at[:neurons, :neurons].set(params["W"].T * c)
    W_eff = W_eff.astype(matmul_dtype)
    WoutT = jnp.zeros((n_pad, out_pad), matmul_dtype).at[:neurons, :out_dim].set(
        params["Wout"].T.astype(matmul_dtype))
    b_out = jnp.zeros((1, out_pad), jnp.float32).at[0, :out_dim].set(params["b_out"])

    # per-block rates scratch: use the matmul dtype only when TM is a clean packed-sublane
    # multiple, so the in-kernel (TB,TM,N)->(TB*TM,N) collapse stays tile-aligned.
    sub = {4: 8, 2: 16, 1: 32}[jnp.dtype(matmul_dtype).itemsize]
    rblock_dtype = matmul_dtype if TM % sub == 0 else jnp.float32

    if time_block is None:
        # auto-size TB against the VMEM budget (drive/out double-buffered, rates single)
        per_tb = TM * (2 * n_pad * jnp.dtype(drive_dtype).itemsize
                       + n_pad * jnp.dtype(rblock_dtype).itemsize
                       + 2 * out_pad * jnp.dtype(out_dtype).itemsize)
        fixed = ((n_pad * n_pad + n_pad * out_pad) * jnp.dtype(matmul_dtype).itemsize
                 + out_pad * 4 + 3 * TM * n_pad * 4)
        budget = int(vmem_limit_bytes * 0.6) - fixed
        time_block = max(1, min(32, budget // max(per_tb, 1)))   # cap unroll length
    TB = _largest_divisor_leq(time_steps, time_block)

    def build(single_buffer):
        return make_dyn_kernel(M=M, TM=TM, T=time_steps, TB=TB, n_pad=n_pad, out_pad=out_pad,
                               decay=1.0 - c, k=k, n=n, matmul_dtype=matmul_dtype,
                               rblock_dtype=rblock_dtype, drive_dtype=drive_dtype,
                               out_dtype=out_dtype, vmem_limit_bytes=vmem_limit_bytes,
                               single_buffer_constants=single_buffer)

    try:
        out_tm = build(True)(drive, W_eff, WoutT, b_out, u0_k)
    except Exception:
        # pipeline_mode=pl.Buffered(1) not supported on this jax version -> default buffering
        out_tm = build(False)(drive, W_eff, WoutT, b_out, u0_k)

    # [time, M_pad, out_pad] -> [batch, trials, time, out_dim]
    out = out_tm[:, :M_real, :out_dim].astype(jnp.float32)
    out = out.reshape(time_steps, trials, batch, out_dim)
    out = jnp.transpose(out, (2, 1, 0, 3))
    return out, (u0, eps, chol)


def reference_forward(params, h_sequence, u0, eps, chol, *, trials, dt, tau, k, n):
    """Pure-JAX reference mirroring the PyTorch forward (with the same noise)."""
    batch, T, _ = h_sequence.shape
    h_neural = h_sequence @ params["Win"].T + params["b_in"]          # [batch, T, N]

    def f(u):
        return k * jnp.maximum(u, 0.0) ** n

    def step(u, xs):
        h_t, e_t = xs
        h_full = jnp.tile(h_t, (trials, 1))
        dxi = e_t @ chol.T * math.sqrt(dt)
        du = (-u + f(u) @ params["W"].T + h_full) / tau + dxi / dt
        u_new = u + du * dt
        out = f(u_new) @ params["Wout"].T + params["b_out"]
        return u_new, out

    _, outs = jax.lax.scan(step, u0, (jnp.transpose(h_neural, (1, 0, 2)), eps))
    out = outs.reshape(T, trials, batch, -1)
    return jnp.transpose(out, (2, 1, 0, 3))


if __name__ == "__main__":
    batch, time_steps, in_dim, neurons, out_dim, trials = 2, 8, 8, 32, 4, 4
    dt, tau, k, n = 0.1, 1.0, 0.3, 2

    key = jax.random.PRNGKey(0)
    k1, k2, k3, k4, k5, k6, k7, k_noise = jax.random.split(key, 8)
    params = {
        "W":     jax.random.normal(k1, (neurons, neurons), jnp.float32) * 0.1,
        "Win":   jax.random.normal(k2, (neurons, in_dim), jnp.float32) / math.sqrt(in_dim),
        "b_in":  jax.random.normal(k3, (neurons,), jnp.float32) * 0.01,
        "Wout":  jax.random.normal(k4, (out_dim, neurons), jnp.float32) / math.sqrt(neurons),
        "b_out": jax.random.normal(k5, (out_dim,), jnp.float32) * 0.01,
    }
    A = jax.random.normal(k6, (neurons, neurons), jnp.float32) * 0.05
    Sigma_xi = 0.01 * jnp.eye(neurons, dtype=jnp.float32) + A @ A.T

    h_sequence = jax.random.normal(k7, (batch, time_steps, in_dim), jnp.float32)

    # ---- f32 path: tight check against the pure-JAX reference ----
    out, (u0, eps, chol) = dynamical_network_forward(
        params, h_sequence, trials=trials, dt=dt, tau=tau, k=k, n=n,
        Sigma_xi=Sigma_xi, key=k_noise,
        matmul_dtype=jnp.float32, drive_dtype=jnp.float32, out_dtype=jnp.float32)
    out = jax.block_until_ready(out)

    ref = reference_forward(params, h_sequence, u0, eps, chol,
                            trials=trials, dt=dt, tau=tau, k=k, n=n)

    assert out.shape == (batch, trials, time_steps, out_dim), out.shape
    assert bool(jnp.all(jnp.isfinite(out)))
    assert bool(jnp.allclose(out, ref, atol=1e-4, rtol=1e-3)), \
        float(jnp.max(jnp.abs(out - ref)))

    # ---- bf16 fast path: MXU-native operands, bf16 drive stream + output writeback ----
    out_bf, _ = dynamical_network_forward(
        params, h_sequence, trials=trials, dt=dt, tau=tau, k=k, n=n,
        Sigma_xi=Sigma_xi, key=k_noise,
        matmul_dtype=jnp.bfloat16, out_dtype=jnp.bfloat16)
    out_bf = jax.block_until_ready(out_bf)

    assert out_bf.shape == (batch, trials, time_steps, out_dim), out_bf.shape
    assert bool(jnp.all(jnp.isfinite(out_bf)))
    assert bool(jnp.allclose(out_bf, ref, atol=2e-2, rtol=2e-2)), \
        float(jnp.max(jnp.abs(out_bf - ref)))

    print("KERNEL_OK")
</pallas_src>

<mosaic_0001>
module attributes {stable_mosaic.version = 11 : i64} {
  func.func @kernel(%arg0: i32, %arg1: i32, %arg2: memref<8x8x128xf32, #tpu.memory_space<vmem>>, %arg3: memref<128x128xf32, #tpu.memory_space<vmem>>, %arg4: memref<128x128xf32, #tpu.memory_space<vmem>>, %arg5: memref<1x128xf32, #tpu.memory_space<vmem>>, %arg6: memref<8x128xf32, #tpu.memory_space<vmem>>, %arg7: memref<8x8x128xf32, #tpu.memory_space<vmem>>, %arg8: memref<8x128xf32, #tpu.memory_space<vmem>>, %arg9: memref<8x128xf32, #tpu.memory_space<vmem>>, %arg10: memref<8x8x128xf32, #tpu.memory_space<vmem>>) attributes {dimension_semantics = [#tpu.dimension_semantics<parallel>, #tpu.dimension_semantics<arbitrary>], iteration_bounds = array<i64: 1, 1>, scalar_prefetch = 0 : i64, scratch_operands = 3 : i64, tpu.core_type = #tpu.core_type<tc>, window_params = [{transform_indices = @transform_0, window_bounds = array<i64: 8, 8, 128>}, {pipeline_mode = #tpu.pipeline_mode<synchronous>, transform_indices = @transform_1, window_bounds = array<i64: 128, 128>}, {pipeline_mode = #tpu.pipeline_mode<synchronous>, transform_indices = @transform_2, window_bounds = array<i64: 128, 128>}, {pipeline_mode = #tpu.pipeline_mode<synchronous>, transform_indices = @transform_3, window_bounds = array<i64: 1, 128>}, {pipeline_mode = #tpu.pipeline_mode<synchronous>, transform_indices = @transform_4, window_bounds = array<i64: 8, 128>}, {transform_indices = @transform_5, window_bounds = array<i64: 8, 8, 128>}]} {
    %c0_i32 = arith.constant 0 : i32
    %0 = arith.cmpi eq, %arg1, %c0_i32 : i32
    %1 = arith.extui %0 : i1 to i32
    %c0_i32_0 = arith.constant 0 : i32
    %2 = arith.cmpi ne, %1, %c0_i32_0 : i32
    scf.if %2 {
      %c0_85 = arith.constant 0 : index
      %c0_86 = arith.constant 0 : index
      %154 = vector.load %arg6[%c0_85, %c0_86] : memref<8x128xf32, #tpu.memory_space<vmem>>, vector<8x128xf32>
      %c0_87 = arith.constant 0 : index
      %c0_88 = arith.constant 0 : index
      %155 = vector.load %arg8[%c0_87, %c0_88] : memref<8x128xf32, #tpu.memory_space<vmem>>, vector<8x128xf32>
      tpu.vector_store %arg8[%c0_87, %c0_88], %154 {strides = array<i32>} : memref<8x128xf32, #tpu.memory_space<vmem>>, vector<8x128xf32>,
      %cst_89 = arith.constant 0.000000e+00 : f32
      %156 = vector.broadcast %cst_89 : f32 to vector<8x128xf32>
      %157 = arith.maximumf %154, %156 : vector<8x128xf32>
      %cst_90 = arith.constant 3.000000e-01 : f32
      %158 = vector.broadcast %cst_90 : f32 to vector<8x128xf32>
      %159 = arith.mulf %158, %157 : vector<8x128xf32>
      %160 = arith.mulf %159, %157 : vector<8x128xf32>
      %c0_91 = arith.constant 0 : index
      %c0_92 = arith.constant 0 : index
      %161 = vector.load %arg9[%c0_91, %c0_92] : memref<8x128xf32, #tpu.memory_space<vmem>>, vector<8x128xf32>
      tpu.vector_store %arg9[%c0_91, %c0_92], %160 {strides = array<i32>} : memref<8x128xf32, #tpu.memory_space<vmem>>, vector<8x128xf32>,
    } else {
    }
    %c0 = arith.constant 0 : index
    %c0_1 = arith.constant 0 : index
    %3 = vector.load %arg3[%c0, %c0_1] : memref<128x128xf32, #tpu.memory_space<vmem>>, vector<128x128xf32>
    %c0_2 = arith.constant 0 : index
    %c0_3 = arith.constant 0 : index
    %4 = vector.load %arg8[%c0_2, %c0_3] : memref<8x128xf32, #tpu.memory_space<vmem>>, vector<8x128xf32>
    %c0_4 = arith.constant 0 : index
    %c0_5 = arith.constant 0 : index
    %5 = vector.load %arg9[%c0_4, %c0_5] : memref<8x128xf32, #tpu.memory_space<vmem>>, vector<8x128xf32>
    %c0_i32_6 = arith.constant 0 : i32
    %cst = arith.constant dense<0.000000e+00> : vector<8x128xf32>
    %6 = tpu.matmul %5, %3, %cst {dimension_numbers = #tpu.dot_dimension_numbers<[1], [0], [0], [1], [0, 0, 1, 1], [], []>} : vector<8x128xf32>, vector<128x128xf32>, vector<8x128xf32> -> vector<8x128xf32>
    %cst_7 = arith.constant 0.899999976 : f32
    %7 = vector.broadcast %cst_7 : f32 to vector<8x128xf32>
    %8 = arith.mulf %4, %7 : vector<8x128xf32>
    %9 = arith.addf %8, %6 : vector<8x128xf32>
    %10 = arith.index_cast %c0_i32_6 : i32 to index
    %c0_8 = arith.constant 0 : index
    %c0_9 = arith.constant 0 : index
    %11 = vector.load %arg2[%10, %c0_8, %c0_9] : memref<8x8x128xf32, #tpu.memory_space<vmem>>, vector<1x8x128xf32>
    %12 = vector.shape_cast %11 : vector<1x8x128xf32> to vector<8x128xf32>
    %13 = arith.addf %9, %12 : vector<8x128xf32>
    %cst_10 = arith.constant 0.000000e+00 : f32
    %14 = vector.broadcast %cst_10 : f32 to vector<8x128xf32>
    %15 = arith.maximumf %13, %14 : vector<8x128xf32>
    %cst_11 = arith.constant 3.000000e-01 : f32
    %16 = vector.broadcast %cst_11 : f32 to vector<8x128xf32>
    %17 = arith.mulf %16, %15 : vector<8x128xf32>
    %18 = arith.mulf %17, %15 : vector<8x128xf32>
    %19 = arith.index_cast %c0_i32_6 : i32 to index
    %c0_12 = arith.constant 0 : index
    %c0_13 = arith.constant 0 : index
    %20 = vector.load %arg10[%19, %c0_12, %c0_13] : memref<8x8x128xf32, #tpu.memory_space<vmem>>, vector<1x8x128xf32>
    %21 = vector.shape_cast %20 : vector<1x8x128xf32> to vector<8x128xf32>
    %22 = vector.shape_cast %18 : vector<8x128xf32> to vector<1x8x128xf32>
    tpu.vector_store %arg10[%19, %c0_12, %c0_13], %22 {strides = array<i32>} : memref<8x8x128xf32, #tpu.memory_space<vmem>>, vector<1x8x128xf32>,
    %c1_i32 = arith.constant 1 : i32
    %cst_14 = arith.constant dense<0.000000e+00> : vector<8x128xf32>
    %23 = tpu.matmul %18, %3, %cst_14 {dimension_numbers = #tpu.dot_dimension_numbers<[1], [0], [0], [1], [0, 0, 1, 1], [], []>} : vector<8x128xf32>, vector<128x128xf32>, vector<8x128xf32> -> vector<8x128xf32>
    %cst_15 = arith.constant 0.899999976 : f32
    %24 = vector.broadcast %cst_15 : f32 to vector<8x128xf32>
    %25 = arith.mulf %13, %24 : vector<8x128xf32>
    %26 = arith.addf %25, %23 : vector<8x128xf32>
    %27 = arith.index_cast %c1_i32 : i32 to index
    %c0_16 = arith.constant 0 : index
    %c0_17 = arith.constant 0 : index
    %28 = vector.load %arg2[%27, %c0_16, %c0_17] : memref<8x8x128xf32, #tpu.memory_space<vmem>>, vector<1x8x128xf32>
    %29 = vector.shape_cast %28 : vector<1x8x128xf32> to vector<8x128xf32>
    %30 = arith.addf %26, %29 : vector<8x128xf32>
    %cst_18 = arith.constant 0.000000e+00 : f32
    %31 = vector.broadcast %cst_18 : f32 to vector<8x128xf32>
    %32 = arith.maximumf %30, %31 : vector<8x128xf32>
    %cst_19 = arith.constant 3.000000e-01 : f32
    %33 = vector.broadcast %cst_19 : f32 to vector<8x128xf32>
    %34 = arith.mulf %33, %32 : vector<8x128xf32>
    %35 = arith.mulf %34, %32 : vector<8x128xf32>
    %36 = arith.index_cast %c1_i32 : i32 to index
    %c0_20 = arith.constant 0 : index
    %c0_21 = arith.constant 0 : index
    %37 = vector.load %arg10[%36, %c0_20, %c0_21] : memref<8x8x128xf32, #tpu.memory_space<vmem>>, vector<1x8x128xf32>
    %38 = vector.shape_cast %37 : vector<1x8x128xf32> to vector<8x128xf32>
    %39 = vector.shape_cast %35 : vector<8x128xf32> to vector<1x8x128xf32>
    tpu.vector_store %arg10[%36, %c0_20, %c0_21], %39 {strides = array<i32>} : memref<8x8x128xf32, #tpu.memory_space<vmem>>, vector<1x8x128xf32>,
    %c2_i32 = arith.constant 2 : i32
    %cst_22 = arith.constant dense<0.000000e+00> : vector<8x128xf32>
    %40 = tpu.matmul %35, %3, %cst_22 {dimension_numbers = #tpu.dot_dimension_numbers<[1], [0], [0], [1], [0, 0, 1, 1], [], []>} : vector<8x128xf32>, vector<128x128xf32>, vector<8x128xf32> -> vector<8x128xf32>
    %cst_23 = arith.constant 0.899999976 : f32
    %41 = vector.broadcast %cst_23 : f32 to vector<8x128xf32>
    %42 = arith.mulf %30, %41 : vector<8x128xf32>
    %43 = arith.addf %42, %40 : vector<8x128xf32>
    %44 = arith.index_cast %c2_i32 : i32 to index
    %c0_24 = arith.constant 0 : index
    %c0_25 = arith.constant 0 : index
    %45 = vector.load %arg2[%44, %c0_24, %c0_25] : memref<8x8x128xf32, #tpu.memory_space<vmem>>, vector<1x8x128xf32>
    %46 = vector.shape_cast %45 : vector<1x8x128xf32> to vector<8x128xf32>
    %47 = arith.addf %43, %46 : vector<8x128xf32>
    %cst_26 = arith.constant 0.000000e+00 : f32
    %48 = vector.broadcast %cst_26 : f32 to vector<8x128xf32>
    %49 = arith.maximumf %47, %48 : vector<8x128xf32>
    %cst_27 = arith.constant 3.000000e-01 : f32
    %50 = vector.broadcast %cst_27 : f32 to vector<8x128xf32>
    %51 = arith.mulf %50, %49 : vector<8x128xf32>
    %52 = arith.mulf %51, %49 : vector<8x128xf32>
    %53 = arith.index_cast %c2_i32 : i32 to index
    %c0_28 = arith.constant 0 : index
    %c0_29 = arith.constant 0 : index
    %54 = vector.load %arg10[%53, %c0_28, %c0_29] : memref<8x8x128xf32, #tpu.memory_space<vmem>>, vector<1x8x128xf32>
    %55 = vector.shape_cast %54 : vector<1x8x128xf32> to vector<8x128xf32>
    %56 = vector.shape_cast %52 : vector<8x128xf32> to vector<1x8x128xf32>
    tpu.vector_store %arg10[%53, %c0_28, %c0_29], %56 {strides = array<i32>} : memref<8x8x128xf32, #tpu.memory_space<vmem>>, vector<1x8x128xf32>,
    %c3_i32 = arith.constant 3 : i32
    %cst_30 = arith.constant dense<0.000000e+00> : vector<8x128xf32>
    %57 = tpu.matmul %52, %3, %cst_30 {dimension_numbers = #tpu.dot_dimension_numbers<[1], [0], [0], [1], [0, 0, 1, 1], [], []>} : vector<8x128xf32>, vector<128x128xf32>, vector<8x128xf32> -> vector<8x128xf32>
    %cst_31 = arith.constant 0.899999976 : f32
    %58 = vector.broadcast %cst_31 : f32 to vector<8x128xf32>
    %59 = arith.mulf %47, %58 : vector<8x128xf32>
    %60 = arith.addf %59, %57 : vector<8x128xf32>
    %61 = arith.index_cast %c3_i32 : i32 to index
    %c0_32 = arith.constant 0 : index
    %c0_33 = arith.constant 0 : index
    %62 = vector.load %arg2[%61, %c0_32, %c0_33] : memref<8x8x128xf32, #tpu.memory_space<vmem>>, vector<1x8x128xf32>
    %63 = vector.shape_cast %62 : vector<1x8x128xf32> to vector<8x128xf32>
    %64 = arith.addf %60, %63 : vector<8x128xf32>
    %cst_34 = arith.constant 0.000000e+00 : f32
    %65 = vector.broadcast %cst_34 : f32 to vector<8x128xf32>
    %66 = arith.maximumf %64, %65 : vector<8x128xf32>
    %cst_35 = arith.constant 3.000000e-01 : f32
    %67 = vector.broadcast %cst_35 : f32 to vector<8x128xf32>
    %68 = arith.mulf %67, %66 : vector<8x128xf32>
    %69 = arith.mulf %68, %66 : vector<8x128xf32>
    %70 = arith.index_cast %c3_i32 : i32 to index
    %c0_36 = arith.constant 0 : index
    %c0_37 = arith.constant 0 : index
    %71 = vector.load %arg10[%70, %c0_36, %c0_37] : memref<8x8x128xf32, #tpu.memory_space<vmem>>, vector<1x8x128xf32>
    %72 = vector.shape_cast %71 : vector<1x8x128xf32> to vector<8x128xf32>
    %73 = vector.shape_cast %69 : vector<8x128xf32> to vector<1x8x128xf32>
    tpu.vector_store %arg10[%70, %c0_36, %c0_37], %73 {strides = array<i32>} : memref<8x8x128xf32, #tpu.memory_space<vmem>>, vector<1x8x128xf32>,
    %c4_i32 = arith.constant 4 : i32
    %cst_38 = arith.constant dense<0.000000e+00> : vector<8x128xf32>
    %74 = tpu.matmul %69, %3, %cst_38 {dimension_numbers = #tpu.dot_dimension_numbers<[1], [0], [0], [1], [0, 0, 1, 1], [], []>} : vector<8x128xf32>, vector<128x128xf32>, vector<8x128xf32> -> vector<8x128xf32>
    %cst_39 = arith.constant 0.899999976 : f32
    %75 = vector.broadcast %cst_39 : f32 to vector<8x128xf32>
    %76 = arith.mulf %64, %75 : vector<8x128xf32>
    %77 = arith.addf %76, %74 : vector<8x128xf32>
    %78 = arith.index_cast %c4_i32 : i32 to index
    %c0_40 = arith.constant 0 : index
    %c0_41 = arith.constant 0 : index
    %79 = vector.load %arg2[%78, %c0_40, %c0_41] : memref<8x8x128xf32, #tpu.memory_space<vmem>>, vector<1x8x128xf32>
    %80 = vector.shape_cast %79 : vector<1x8x128xf32> to vector<8x128xf32>
    %81 = arith.addf %77, %80 : vector<8x128xf32>
    %cst_42 = arith.constant 0.000000e+00 : f32
    %82 = vector.broadcast %cst_42 : f32 to vector<8x128xf32>
    %83 = arith.maximumf %81, %82 : vector<8x128xf32>
    %cst_43 = arith.constant 3.000000e-01 : f32
    %84 = vector.broadcast %cst_43 : f32 to vector<8x128xf32>
    %85 = arith.mulf %84, %83 : vector<8x128xf32>
    %86 = arith.mulf %85, %83 : vector<8x128xf32>
    %87 = arith.index_cast %c4_i32 : i32 to index
    %c0_44 = arith.constant 0 : index
    %c0_45 = arith.constant 0 : index
    %88 = vector.load %arg10[%87, %c0_44, %c0_45] : memref<8x8x128xf32, #tpu.memory_space<vmem>>, vector<1x8x128xf32>
    %89 = vector.shape_cast %88 : vector<1x8x128xf32> to vector<8x128xf32>
    %90 = vector.shape_cast %86 : vector<8x128xf32> to vector<1x8x128xf32>
    tpu.vector_store %arg10[%87, %c0_44, %c0_45], %90 {strides = array<i32>} : memref<8x8x128xf32, #tpu.memory_space<vmem>>, vector<1x8x128xf32>,
    %c5_i32 = arith.constant 5 : i32
    %cst_46 = arith.constant dense<0.000000e+00> : vector<8x128xf32>
    %91 = tpu.matmul %86, %3, %cst_46 {dimension_numbers = #tpu.dot_dimension_numbers<[1], [0], [0], [1], [0, 0, 1, 1], [], []>} : vector<8x128xf32>, vector<128x128xf32>, vector<8x128xf32> -> vector<8x128xf32>
    %cst_47 = arith.constant 0.899999976 : f32
    %92 = vector.broadcast %cst_47 : f32 to vector<8x128xf32>
    %93 = arith.mulf %81, %92 : vector<8x128xf32>
    %94 = arith.addf %93, %91 : vector<8x128xf32>
    %95 = arith.index_cast %c5_i32 : i32 to index
    %c0_48 = arith.constant 0 : index
    %c0_49 = arith.constant 0 : index
    %96 = vector.load %arg2[%95, %c0_48, %c0_49] : memref<8x8x128xf32, #tpu.memory_space<vmem>>, vector<1x8x128xf32>
    %97 = vector.shape_cast %96 : vector<1x8x128xf32> to vector<8x128xf32>
    %98 = arith.addf %94, %97 : vector<8x128xf32>
    %cst_50 = arith.constant 0.000000e+00 : f32
    %99 = vector.broadcast %cst_50 : f32 to vector<8x128xf32>
    %100 = arith.maximumf %98, %99 : vector<8x128xf32>
    %cst_51 = arith.constant 3.000000e-01 : f32
    %101 = vector.broadcast %cst_51 : f32 to vector<8x128xf32>
    %102 = arith.mulf %101, %100 : vector<8x128xf32>
    %103 = arith.mulf %102, %100 : vector<8x128xf32>
    %104 = arith.index_cast %c5_i32 : i32 to index
    %c0_52 = arith.constant 0 : index
    %c0_53 = arith.constant 0 : index
    %105 = vector.load %arg10[%104, %c0_52, %c0_53] : memref<8x8x128xf32, #tpu.memory_space<vmem>>, vector<1x8x128xf32>
    %106 = vector.shape_cast %105 : vector<1x8x128xf32> to vector<8x128xf32>
    %107 = vector.shape_cast %103 : vector<8x128xf32> to vector<1x8x128xf32>
    tpu.vector_store %arg10[%104, %c0_52, %c0_53], %107 {strides = array<i32>} : memref<8x8x128xf32, #tpu.memory_space<vmem>>, vector<1x8x128xf32>,
    %c6_i32 = arith.constant 6 : i32
    %cst_54 = arith.constant dense<0.000000e+00> : vector<8x128xf32>
    %108 = tpu.matmul %103, %3, %cst_54 {dimension_numbers = #tpu.dot_dimension_numbers<[1], [0], [0], [1], [0, 0, 1, 1], [], []>} : vector<8x128xf32>, vector<128x128xf32>, vector<8x128xf32> -> vector<8x128xf32>
    %cst_55 = arith.constant 0.899999976 : f32
    %109 = vector.broadcast %cst_55 : f32 to vector<8x128xf32>
    %110 = arith.mulf %98, %109 : vector<8x128xf32>
    %111 = arith.addf %110, %108 : vector<8x128xf32>
    %112 = arith.index_cast %c6_i32 : i32 to index
    %c0_56 = arith.constant 0 : index
    %c0_57 = arith.constant 0 : index
    %113 = vector.load %arg2[%112, %c0_56, %c0_57] : memref<8x8x128xf32, #tpu.memory_space<vmem>>, vector<1x8x128xf32>
    %114 = vector.shape_cast %113 : vector<1x8x128xf32> to vector<8x128xf32>
    %115 = arith.addf %111, %114 : vector<8x128xf32>
    %cst_58 = arith.constant 0.000000e+00 : f32
    %116 = vector.broadcast %cst_58 : f32 to vector<8x128xf32>
    %117 = arith.maximumf %115, %116 : vector<8x128xf32>
    %cst_59 = arith.constant 3.000000e-01 : f32
    %118 = vector.broadcast %cst_59 : f32 to vector<8x128xf32>
    %119 = arith.mulf %118, %117 : vector<8x128xf32>
    %120 = arith.mulf %119, %117 : vector<8x128xf32>
    %121 = arith.index_cast %c6_i32 : i32 to index
    %c0_60 = arith.constant 0 : index
    %c0_61 = arith.constant 0 : index
    %122 = vector.load %arg10[%121, %c0_60, %c0_61] : memref<8x8x128xf32, #tpu.memory_space<vmem>>, vector<1x8x128xf32>
    %123 = vector.shape_cast %122 : vector<1x8x128xf32> to vector<8x128xf32>
    %124 = vector.shape_cast %120 : vector<8x128xf32> to vector<1x8x128xf32>
    tpu.vector_store %arg10[%121, %c0_60, %c0_61], %124 {strides = array<i32>} : memref<8x8x128xf32, #tpu.memory_space<vmem>>, vector<1x8x128xf32>,
    %c7_i32 = arith.constant 7 : i32
    %cst_62 = arith.constant dense<0.000000e+00> : vector<8x128xf32>
    %125 = tpu.matmul %120, %3, %cst_62 {dimension_numbers = #tpu.dot_dimension_numbers<[1], [0], [0], [1], [0, 0, 1, 1], [], []>} : vector<8x128xf32>, vector<128x128xf32>, vector<8x128xf32> -> vector<8x128xf32>
    %cst_63 = arith.constant 0.899999976 : f32
    %126 = vector.broadcast %cst_63 : f32 to vector<8x128xf32>
    %127 = arith.mulf %115, %126 : vector<8x128xf32>
    %128 = arith.addf %127, %125 : vector<8x128xf32>
    %129 = arith.index_cast %c7_i32 : i32 to index
    %c0_64 = arith.constant 0 : index
    %c0_65 = arith.constant 0 : index
    %130 = vector.load %arg2[%129, %c0_64, %c0_65] : memref<8x8x128xf32, #tpu.memory_space<vmem>>, vector<1x8x128xf32>
    %131 = vector.shape_cast %130 : vector<1x8x128xf32> to vector<8x128xf32>
    %132 = arith.addf %128, %131 : vector<8x128xf32>
    %cst_66 = arith.constant 0.000000e+00 : f32
    %133 = vector.broadcast %cst_66 : f32 to vector<8x128xf32>
    %134 = arith.maximumf %132, %133 : vector<8x128xf32>
    %cst_67 = arith.constant 3.000000e-01 : f32
    %135 = vector.broadcast %cst_67 : f32 to vector<8x128xf32>
    %136 = arith.mulf %135, %134 : vector<8x128xf32>
    %137 = arith.mulf %136, %134 : vector<8x128xf32>
    %138 = arith.index_cast %c7_i32 : i32 to index
    %c0_68 = arith.constant 0 : index
    %c0_69 = arith.constant 0 : index
    %139 = vector.load %arg10[%138, %c0_68, %c0_69] : memref<8x8x128xf32, #tpu.memory_space<vmem>>, vector<1x8x128xf32>
    %140 = vector.shape_cast %139 : vector<1x8x128xf32> to vector<8x128xf32>
    %141 = vector.shape_cast %137 : vector<8x128xf32> to vector<1x8x128xf32>
    tpu.vector_store %arg10[%138, %c0_68, %c0_69], %141 {strides = array<i32>} : memref<8x8x128xf32, #tpu.memory_space<vmem>>, vector<1x8x128xf32>,
    %c8_i32 = arith.constant 8 : i32
    %c0_70 = arith.constant 0 : index
    %c0_71 = arith.constant 0 : index
    %142 = vector.load %arg8[%c0_70, %c0_71] : memref<8x128xf32, #tpu.memory_space<vmem>>, vector<8x128xf32>
    tpu.vector_store %arg8[%c0_70, %c0_71], %132 {strides = array<i32>} : memref<8x128xf32, #tpu.memory_space<vmem>>, vector<8x128xf32>,
    %c0_72 = arith.constant 0 : index
    %c0_73 = arith.constant 0 : index
    %143 = vector.load %arg9[%c0_72, %c0_73] : memref<8x128xf32, #tpu.memory_space<vmem>>, vector<8x128xf32>
    tpu.vector_store %arg9[%c0_72, %c0_73], %137 {strides = array<i32>} : memref<8x128xf32, #tpu.memory_space<vmem>>, vector<8x128xf32>,
    %c0_74 = arith.constant 0 : index
    %c0_75 = arith.constant 0 : index
    %c0_76 = arith.constant 0 : index
    %144 = vector.load %arg10[%c0_74, %c0_75, %c0_76] : memref<8x8x128xf32, #tpu.memory_space<vmem>>, vector<8x8x128xf32>
    %145 = vector.shape_cast %144 : vector<8x8x128xf32> to vector<64x128xf32>
    %c0_77 = arith.constant 0 : index
    %c0_78 = arith.constant 0 : index
    %146 = vector.load %arg4[%c0_77, %c0_78] : memref<128x128xf32, #tpu.memory_space<vmem>>, vector<128x128xf32>
    %cst_79 = arith.constant dense<0.000000e+00> : vector<64x128xf32>
    %147 = tpu.matmul %145, %146, %cst_79 {dimension_numbers = #tpu.dot_dimension_numbers<[1], [0], [0], [1], [0, 0, 1, 1], [], []>} : vector<64x128xf32>, vector<128x128xf32>, vector<64x128xf32> -> vector<64x128xf32>
    %148 = vector.shape_cast %147 : vector<64x128xf32> to vector<8x8x128xf32>
    %c0_80 = arith.constant 0 : index
    %c0_81 = arith.constant 0 : index
    %149 = vector.load %arg5[%c0_80, %c0_81] : memref<1x128xf32, #tpu.memory_space<vmem>>, vector<1x128xf32>
    %150 = vector.shape_cast %149 : vector<1x128xf32> to vector<1x1x128xf32>
    %151 = vector.broadcast %150 : vector<1x1x128xf32> to vector<8x8x128xf32>
    %152 = arith.addf %148, %151 : vector<8x8x128xf32>
    %c0_82 = arith.constant 0 : index
    %c0_83 = arith.constant 0 : index
    %c0_84 = arith.constant 0 : index
    %153 = vector.load %arg7[%c0_82, %c0_83, %c0_84] : memref<8x8x128xf32, #tpu.memory_space<vmem>>, vector<8x8x128xf32>
    tpu.vector_store %arg7[%c0_82, %c0_83, %c0_84], %152 {strides = array<i32>} : memref<8x8x128xf32, #tpu.memory_space<vmem>>, vector<8x8x128xf32>,
    return
  }
  func.func @transform_0(%arg0: i32, %arg1: i32) -> (i32, i32, i32) {
    %c0_i32 = arith.constant 0 : i32
    %c0_i32_0 = arith.constant 0 : i32
    return %arg1, %arg0, %c0_i32 : i32, i32, i32
  }
  func.func @transform_1(%arg0: i32, %arg1: i32) -> (i32, i32) {
    %c0_i32 = arith.constant 0 : i32
    %c0_i32_0 = arith.constant 0 : i32
    %c0_i32_1 = arith.constant 0 : i32
    return %c0_i32, %c0_i32_0 : i32, i32
  }
  func.func @transform_2(%arg0: i32, %arg1: i32) -> (i32, i32) {
    %c0_i32 = arith.constant 0 : i32
    %c0_i32_0 = arith.constant 0 : i32
    %c0_i32_1 = arith.constant 0 : i32
    return %c0_i32, %c0_i32_0 : i32, i32
  }
  func.func @transform_3(%arg0: i32, %arg1: i32) -> (i32, i32) {
    %c0_i32 = arith.constant 0 : i32
    %c0_i32_0 = arith.constant 0 : i32
    %c0_i32_1 = arith.constant 0 : i32
    return %c0_i32, %c0_i32_0 : i32, i32
  }
  func.func @transform_4(%arg0: i32, %arg1: i32) -> (i32, i32) {
    %c0_i32 = arith.constant 0 : i32
    %c0_i32_0 = arith.constant 0 : i32
    return %arg0, %c0_i32 : i32, i32
  }
  func.func @transform_5(%arg0: i32, %arg1: i32) -> (i32, i32, i32) {
    %c0_i32 = arith.constant 0 : i32
    %c0_i32_0 = arith.constant 0 : i32
    return %arg1, %arg0, %c0_i32 : i32, i32, i32
  }
}

module attributes {stable_mosaic.version = 11 : i64} {
  func.func @kernel(%arg0: i32, %arg1: i32, %arg2: memref<8x8x128xf32, #tpu.memory_space<vmem>>, %arg3: memref<128x128xf32, #tpu.memory_space<vmem>>, %arg4: memref<128x128xf32, #tpu.memory_space<vmem>>, %arg5: memref<1x128xf32, #tpu.memory_space<vmem>>, %arg6: memref<8x128xf32, #tpu.memory_space<vmem>>, %arg7: memref<8x8x128xf32, #tpu.memory_space<vmem>>, %arg8: memref<8x128xf32, #tpu.memory_space<vmem>>, %arg9: memref<8x128xf32, #tpu.memory_space<vmem>>, %arg10: memref<8x8x128xf32, #tpu.memory_space<vmem>>) attributes {dimension_semantics = [#tpu.dimension_semantics<parallel>, #tpu.dimension_semantics<arbitrary>], iteration_bounds = array<i64: 1, 1>, scalar_prefetch = 0 : i64, scratch_operands = 3 : i64, tpu.core_type = #tpu.core_type<tc>, window_params = [{transform_indices = @transform_0, window_bounds = array<i64: 8, 8, 128>}, {pipeline_mode = #tpu.pipeline_mode<synchronous>, transform_indices = @transform_1, window_bounds = array<i64: 128, 128>}, {pipeline_mode = #tpu.pipeline_mode<synchronous>, transform_indices = @transform_2, window_bounds = array<i64: 128, 128>}, {pipeline_mode = #tpu.pipeline_mode<synchronous>, transform_indices = @transform_3, window_bounds = array<i64: 1, 128>}, {transform_indices = @transform_4, window_bounds = array<i64: 8, 128>}, {transform_indices = @transform_5, window_bounds = array<i64: 8, 8, 128>}]} {
    %c0_i32 = arith.constant 0 : i32
    %0 = arith.cmpi eq, %arg1, %c0_i32 : i32
    %1 = arith.extui %0 : i1 to i32
    %c0_i32_0 = arith.constant 0 : i32
    %2 = arith.cmpi ne, %1, %c0_i32_0 : i32
    scf.if %2 {
      %c0_85 = arith.constant 0 : index
      %c0_86 = arith.constant 0 : index
      %154 = vector.load %arg6[%c0_85, %c0_86] : memref<8x128xf32, #tpu.memory_space<vmem>>, vector<8x128xf32>
      %c0_87 = arith.constant 0 : index
      %c0_88 = arith.constant 0 : index
      %155 = vector.load %arg8[%c0_87, %c0_88] : memref<8x128xf32, #tpu.memory_space<vmem>>, vector<8x128xf32>
      tpu.vector_store %arg8[%c0_87, %c0_88], %154 {strides = array<i32>} : memref<8x128xf32, #tpu.memory_space<vmem>>, vector<8x128xf32>,
      %cst_89 = arith.constant 0.000000e+00 : f32
      %156 = vector.broadcast %cst_89 : f32 to vector<8x128xf32>
      %157 = arith.maximumf %154, %156 : vector<8x128xf32>
      %cst_90 = arith.constant 3.000000e-01 : f32
      %158 = vector.broadcast %cst_90 : f32 to vector<8x128xf32>
      %159 = arith.mulf %158, %157 : vector<8x128xf32>
      %160 = arith.mulf %159, %157 : vector<8x128xf32>
      %c0_91 = arith.constant 0 : index
      %c0_92 = arith.constant 0 : index
      %161 = vector.load %arg9[%c0_91, %c0_92] : memref<8x128xf32, #tpu.memory_space<vmem>>, vector<8x128xf32>
      tpu.vector_store %arg9[%c0_91, %c0_92], %160 {strides = array<i32>} : memref<8x128xf32, #tpu.memory_space<vmem>>, vector<8x128xf32>,
    } else {
    }
    %c0 = arith.constant 0 : index
    %c0_1 = arith.constant 0 : index
    %3 = vector.load %arg3[%c0, %c0_1] : memref<128x128xf32, #tpu.memory_space<vmem>>, vector<128x128xf32>
    %c0_2 = arith.constant 0 : index
    %c0_3 = arith.constant 0 : index
    %4 = vector.load %arg8[%c0_2, %c0_3] : memref<8x128xf32, #tpu.memory_space<vmem>>, vector<8x128xf32>
    %c0_4 = arith.constant 0 : index
    %c0_5 = arith.constant 0 : index
    %5 = vector.load %arg9[%c0_4, %c0_5] : memref<8x128xf32, #tpu.memory_space<vmem>>, vector<8x128xf32>
    %c0_i32_6 = arith.constant 0 : i32
    %cst = arith.constant dense<0.000000e+00> : vector<8x128xf32>
    %6 = tpu.matmul %5, %3, %cst {dimension_numbers = #tpu.dot_dimension_numbers<[1], [0], [0], [1], [0, 0, 1, 1], [], []>} : vector<8x128xf32>, vector<128x128xf32>, vector<8x128xf32> -> vector<8x128xf32>
    %cst_7 = arith.constant 0.899999976 : f32
    %7 = vector.broadcast %cst_7 : f32 to vector<8x128xf32>
    %8 = arith.mulf %4, %7 : vector<8x128xf32>
    %9 = arith.addf %8, %6 : vector<8x128xf32>
    %10 = arith.index_cast %c0_i32_6 : i32 to index
    %c0_8 = arith.constant 0 : index
    %c0_9 = arith.constant 0 : index
    %11 = vector.load %arg2[%10, %c0_8, %c0_9] : memref<8x8x128xf32, #tpu.memory_space<vmem>>, vector<1x8x128xf32>
    %12 = vector.shape_cast %11 : vector<1x8x128xf32> to vector<8x128xf32>
    %13 = arith.addf %9, %12 : vector<8x128xf32>
    %cst_10 = arith.constant 0.000000e+00 : f32
    %14 = vector.broadcast %cst_10 : f32 to vector<8x128xf32>
    %15 = arith.maximumf %13, %14 : vector<8x128xf32>
    %cst_11 = arith.constant 3.000000e-01 : f32
    %16 = vector.broadcast %cst_11 : f32 to vector<8x128xf32>
    %17 = arith.mulf %16, %15 : vector<8x128xf32>
    %18 = arith.mulf %17, %15 : vector<8x128xf32>
    %19 = arith.index_cast %c0_i32_6 : i32 to index
    %c0_12 = arith.constant 0 : index
    %c0_13 = arith.constant 0 : index
    %20 = vector.load %arg10[%19, %c0_12, %c0_13] : memref<8x8x128xf32, #tpu.memory_space<vmem>>, vector<1x8x128xf32>
    %21 = vector.shape_cast %20 : vector<1x8x128xf32> to vector<8x128xf32>
    %22 = vector.shape_cast %18 : vector<8x128xf32> to vector<1x8x128xf32>
    tpu.vector_store %arg10[%19, %c0_12, %c0_13], %22 {strides = array<i32>} : memref<8x8x128xf32, #tpu.memory_space<vmem>>, vector<1x8x128xf32>,
    %c1_i32 = arith.constant 1 : i32
    %cst_14 = arith.constant dense<0.000000e+00> : vector<8x128xf32>
    %23 = tpu.matmul %18, %3, %cst_14 {dimension_numbers = #tpu.dot_dimension_numbers<[1], [0], [0], [1], [0, 0, 1, 1], [], []>} : vector<8x128xf32>, vector<128x128xf32>, vector<8x128xf32> -> vector<8x128xf32>
    %cst_15 = arith.constant 0.899999976 : f32
    %24 = vector.broadcast %cst_15 : f32 to vector<8x128xf32>
    %25 = arith.mulf %13, %24 : vector<8x128xf32>
    %26 = arith.addf %25, %23 : vector<8x128xf32>
    %27 = arith.index_cast %c1_i32 : i32 to index
    %c0_16 = arith.constant 0 : index
    %c0_17 = arith.constant 0 : index
    %28 = vector.load %arg2[%27, %c0_16, %c0_17] : memref<8x8x128xf32, #tpu.memory_space<vmem>>, vector<1x8x128xf32>
    %29 = vector.shape_cast %28 : vector<1x8x128xf32> to vector<8x128xf32>
    %30 = arith.addf %26, %29 : vector<8x128xf32>
    %cst_18 = arith.constant 0.000000e+00 : f32
    %31 = vector.broadcast %cst_18 : f32 to vector<8x128xf32>
    %32 = arith.maximumf %30, %31 : vector<8x128xf32>
    %cst_19 = arith.constant 3.000000e-01 : f32
    %33 = vector.broadcast %cst_19 : f32 to vector<8x128xf32>
    %34 = arith.mulf %33, %32 : vector<8x128xf32>
    %35 = arith.mulf %34, %32 : vector<8x128xf32>
    %36 = arith.index_cast %c1_i32 : i32 to index
    %c0_20 = arith.constant 0 : index
    %c0_21 = arith.constant 0 : index
    %37 = vector.load %arg10[%36, %c0_20, %c0_21] : memref<8x8x128xf32, #tpu.memory_space<vmem>>, vector<1x8x128xf32>
    %38 = vector.shape_cast %37 : vector<1x8x128xf32> to vector<8x128xf32>
    %39 = vector.shape_cast %35 : vector<8x128xf32> to vector<1x8x128xf32>
    tpu.vector_store %arg10[%36, %c0_20, %c0_21], %39 {strides = array<i32>} : memref<8x8x128xf32, #tpu.memory_space<vmem>>, vector<1x8x128xf32>,
    %c2_i32 = arith.constant 2 : i32
    %cst_22 = arith.constant dense<0.000000e+00> : vector<8x128xf32>
    %40 = tpu.matmul %35, %3, %cst_22 {dimension_numbers = #tpu.dot_dimension_numbers<[1], [0], [0], [1], [0, 0, 1, 1], [], []>} : vector<8x128xf32>, vector<128x128xf32>, vector<8x128xf32> -> vector<8x128xf32>
    %cst_23 = arith.constant 0.899999976 : f32
    %41 = vector.broadcast %cst_23 : f32 to vector<8x128xf32>
    %42 = arith.mulf %30, %41 : vector<8x128xf32>
    %43 = arith.addf %42, %40 : vector<8x128xf32>
    %44 = arith.index_cast %c2_i32 : i32 to index
    %c0_24 = arith.constant 0 : index
    %c0_25 = arith.constant 0 : index
    %45 = vector.load %arg2[%44, %c0_24, %c0_25] : memref<8x8x128xf32, #tpu.memory_space<vmem>>, vector<1x8x128xf32>
    %46 = vector.shape_cast %45 : vector<1x8x128xf32> to vector<8x128xf32>
    %47 = arith.addf %43, %46 : vector<8x128xf32>
    %cst_26 = arith.constant 0.000000e+00 : f32
    %48 = vector.broadcast %cst_26 : f32 to vector<8x128xf32>
    %49 = arith.maximumf %47, %48 : vector<8x128xf32>
    %cst_27 = arith.constant 3.000000e-01 : f32
    %50 = vector.broadcast %cst_27 : f32 to vector<8x128xf32>
    %51 = arith.mulf %50, %49 : vector<8x128xf32>
    %52 = arith.mulf %51, %49 : vector<8x128xf32>
    %53 = arith.index_cast %c2_i32 : i32 to index
    %c0_28 = arith.constant 0 : index
    %c0_29 = arith.constant 0 : index
    %54 = vector.load %arg10[%53, %c0_28, %c0_29] : memref<8x8x128xf32, #tpu.memory_space<vmem>>, vector<1x8x128xf32>
    %55 = vector.shape_cast %54 : vector<1x8x128xf32> to vector<8x128xf32>
    %56 = vector.shape_cast %52 : vector<8x128xf32> to vector<1x8x128xf32>
    tpu.vector_store %arg10[%53, %c0_28, %c0_29], %56 {strides = array<i32>} : memref<8x8x128xf32, #tpu.memory_space<vmem>>, vector<1x8x128xf32>,
    %c3_i32 = arith.constant 3 : i32
    %cst_30 = arith.constant dense<0.000000e+00> : vector<8x128xf32>
    %57 = tpu.matmul %52, %3, %cst_30 {dimension_numbers = #tpu.dot_dimension_numbers<[1], [0], [0], [1], [0, 0, 1, 1], [], []>} : vector<8x128xf32>, vector<128x128xf32>, vector<8x128xf32> -> vector<8x128xf32>
    %cst_31 = arith.constant 0.899999976 : f32
    %58 = vector.broadcast %cst_31 : f32 to vector<8x128xf32>
    %59 = arith.mulf %47, %58 : vector<8x128xf32>
    %60 = arith.addf %59, %57 : vector<8x128xf32>
    %61 = arith.index_cast %c3_i32 : i32 to index
    %c0_32 = arith.constant 0 : index
    %c0_33 = arith.constant 0 : index
    %62 = vector.load %arg2[%61, %c0_32, %c0_33] : memref<8x8x128xf32, #tpu.memory_space<vmem>>, vector<1x8x128xf32>
    %63 = vector.shape_cast %62 : vector<1x8x128xf32> to vector<8x128xf32>
    %64 = arith.addf %60, %63 : vector<8x128xf32>
    %cst_34 = arith.constant 0.000000e+00 : f32
    %65 = vector.broadcast %cst_34 : f32 to vector<8x128xf32>
    %66 = arith.maximumf %64, %65 : vector<8x128xf32>
    %cst_35 = arith.constant 3.000000e-01 : f32
    %67 = vector.broadcast %cst_35 : f32 to vector<8x128xf32>
    %68 = arith.mulf %67, %66 : vector<8x128xf32>
    %69 = arith.mulf %68, %66 : vector<8x128xf32>
    %70 = arith.index_cast %c3_i32 : i32 to index
    %c0_36 = arith.constant 0 : index
    %c0_37 = arith.constant 0 : index
    %71 = vector.load %arg10[%70, %c0_36, %c0_37] : memref<8x8x128xf32, #tpu.memory_space<vmem>>, vector<1x8x128xf32>
    %72 = vector.shape_cast %71 : vector<1x8x128xf32> to vector<8x128xf32>
    %73 = vector.shape_cast %69 : vector<8x128xf32> to vector<1x8x128xf32>
    tpu.vector_store %arg10[%70, %c0_36, %c0_37], %73 {strides = array<i32>} : memref<8x8x128xf32, #tpu.memory_space<vmem>>, vector<1x8x128xf32>,
    %c4_i32 = arith.constant 4 : i32
    %cst_38 = arith.constant dense<0.000000e+00> : vector<8x128xf32>
    %74 = tpu.matmul %69, %3, %cst_38 {dimension_numbers = #tpu.dot_dimension_numbers<[1], [0], [0], [1], [0, 0, 1, 1], [], []>} : vector<8x128xf32>, vector<128x128xf32>, vector<8x128xf32> -> vector<8x128xf32>
    %cst_39 = arith.constant 0.899999976 : f32
    %75 = vector.broadcast %cst_39 : f32 to vector<8x128xf32>
    %76 = arith.mulf %64, %75 : vector<8x128xf32>
    %77 = arith.addf %76, %74 : vector<8x128xf32>
    %78 = arith.index_cast %c4_i32 : i32 to index
    %c0_40 = arith.constant 0 : index
    %c0_41 = arith.constant 0 : index
    %79 = vector.load %arg2[%78, %c0_40, %c0_41] : memref<8x8x128xf32, #tpu.memory_space<vmem>>, vector<1x8x128xf32>
    %80 = vector.shape_cast %79 : vector<1x8x128xf32> to vector<8x128xf32>
    %81 = arith.addf %77, %80 : vector<8x128xf32>
    %cst_42 = arith.constant 0.000000e+00 : f32
    %82 = vector.broadcast %cst_42 : f32 to vector<8x128xf32>
    %83 = arith.maximumf %81, %82 : vector<8x128xf32>
    %cst_43 = arith.constant 3.000000e-01 : f32
    %84 = vector.broadcast %cst_43 : f32 to vector<8x128xf32>
    %85 = arith.mulf %84, %83 : vector<8x128xf32>
    %86 = arith.mulf %85, %83 : vector<8x128xf32>
    %87 = arith.index_cast %c4_i32 : i32 to index
    %c0_44 = arith.constant 0 : index
    %c0_45 = arith.constant 0 : index
    %88 = vector.load %arg10[%87, %c0_44, %c0_45] : memref<8x8x128xf32, #tpu.memory_space<vmem>>, vector<1x8x128xf32>
    %89 = vector.shape_cast %88 : vector<1x8x128xf32> to vector<8x128xf32>
    %90 = vector.shape_cast %86 : vector<8x128xf32> to vector<1x8x128xf32>
    tpu.vector_store %arg10[%87, %c0_44, %c0_45], %90 {strides = array<i32>} : memref<8x8x128xf32, #tpu.memory_space<vmem>>, vector<1x8x128xf32>,
    %c5_i32 = arith.constant 5 : i32
    %cst_46 = arith.constant dense<0.000000e+00> : vector<8x128xf32>
    %91 = tpu.matmul %86, %3, %cst_46 {dimension_numbers = #tpu.dot_dimension_numbers<[1], [0], [0], [1], [0, 0, 1, 1], [], []>} : vector<8x128xf32>, vector<128x128xf32>, vector<8x128xf32> -> vector<8x128xf32>
    %cst_47 = arith.constant 0.899999976 : f32
    %92 = vector.broadcast %cst_47 : f32 to vector<8x128xf32>
    %93 = arith.mulf %81, %92 : vector<8x128xf32>
    %94 = arith.addf %93, %91 : vector<8x128xf32>
    %95 = arith.index_cast %c5_i32 : i32 to index
    %c0_48 = arith.constant 0 : index
    %c0_49 = arith.constant 0 : index
    %96 = vector.load %arg2[%95, %c0_48, %c0_49] : memref<8x8x128xf32, #tpu.memory_space<vmem>>, vector<1x8x128xf32>
    %97 = vector.shape_cast %96 : vector<1x8x128xf32> to vector<8x128xf32>
    %98 = arith.addf %94, %97 : vector<8x128xf32>
    %cst_50 = arith.constant 0.000000e+00 : f32
    %99 = vector.broadcast %cst_50 : f32 to vector<8x128xf32>
    %100 = arith.maximumf %98, %99 : vector<8x128xf32>
    %cst_51 = arith.constant 3.000000e-01 : f32
    %101 = vector.broadcast %cst_51 : f32 to vector<8x128xf32>
    %102 = arith.mulf %101, %100 : vector<8x128xf32>
    %103 = arith.mulf %102, %100 : vector<8x128xf32>
    %104 = arith.index_cast %c5_i32 : i32 to index
    %c0_52 = arith.constant 0 : index
    %c0_53 = arith.constant 0 : index
    %105 = vector.load %arg10[%104, %c0_52, %c0_53] : memref<8x8x128xf32, #tpu.memory_space<vmem>>, vector<1x8x128xf32>
    %106 = vector.shape_cast %105 : vector<1x8x128xf32> to vector<8x128xf32>
    %107 = vector.shape_cast %103 : vector<8x128xf32> to vector<1x8x128xf32>
    tpu.vector_store %arg10[%104, %c0_52, %c0_53], %107 {strides = array<i32>} : memref<8x8x128xf32, #tpu.memory_space<vmem>>, vector<1x8x128xf32>,
    %c6_i32 = arith.constant 6 : i32
    %cst_54 = arith.constant dense<0.000000e+00> : vector<8x128xf32>
    %108 = tpu.matmul %103, %3, %cst_54 {dimension_numbers = #tpu.dot_dimension_numbers<[1], [0], [0], [1], [0, 0, 1, 1], [], []>} : vector<8x128xf32>, vector<128x128xf32>, vector<8x128xf32> -> vector<8x128xf32>
    %cst_55 = arith.constant 0.899999976 : f32
    %109 = vector.broadcast %cst_55 : f32 to vector<8x128xf32>
    %110 = arith.mulf %98, %109 : vector<8x128xf32>
    %111 = arith.addf %110, %108 : vector<8x128xf32>
    %112 = arith.index_cast %c6_i32 : i32 to index
    %c0_56 = arith.constant 0 : index
    %c0_57 = arith.constant 0 : index
    %113 = vector.load %arg2[%112, %c0_56, %c0_57] : memref<8x8x128xf32, #tpu.memory_space<vmem>>, vector<1x8x128xf32>
    %114 = vector.shape_cast %113 : vector<1x8x128xf32> to vector<8x128xf32>
    %115 = arith.addf %111, %114 : vector<8x128xf32>
    %cst_58 = arith.constant 0.000000e+00 : f32
    %116 = vector.broadcast %cst_58 : f32 to vector<8x128xf32>
    %117 = arith.maximumf %115, %116 : vector<8x128xf32>
    %cst_59 = arith.constant 3.000000e-01 : f32
    %118 = vector.broadcast %cst_59 : f32 to vector<8x128xf32>
    %119 = arith.mulf %118, %117 : vector<8x128xf32>
    %120 = arith.mulf %119, %117 : vector<8x128xf32>
    %121 = arith.index_cast %c6_i32 : i32 to index
    %c0_60 = arith.constant 0 : index
    %c0_61 = arith.constant 0 : index
    %122 = vector.load %arg10[%121, %c0_60, %c0_61] : memref<8x8x128xf32, #tpu.memory_space<vmem>>, vector<1x8x128xf32>
    %123 = vector.shape_cast %122 : vector<1x8x128xf32> to vector<8x128xf32>
    %124 = vector.shape_cast %120 : vector<8x128xf32> to vector<1x8x128xf32>
    tpu.vector_store %arg10[%121, %c0_60, %c0_61], %124 {strides = array<i32>} : memref<8x8x128xf32, #tpu.memory_space<vmem>>, vector<1x8x128xf32>,
    %c7_i32 = arith.constant 7 : i32
    %cst_62 = arith.constant dense<0.000000e+00> : vector<8x128xf32>
    %125 = tpu.matmul %120, %3, %cst_62 {dimension_numbers = #tpu.dot_dimension_numbers<[1], [0], [0], [1], [0, 0, 1, 1], [], []>} : vector<8x128xf32>, vector<128x128xf32>, vector<8x128xf32> -> vector<8x128xf32>
    %cst_63 = arith.constant 0.899999976 : f32
    %126 = vector.broadcast %cst_63 : f32 to vector<8x128xf32>
    %127 = arith.mulf %115, %126 : vector<8x128xf32>
    %128 = arith.addf %127, %125 : vector<8x128xf32>
    %129 = arith.index_cast %c7_i32 : i32 to index
    %c0_64 = arith.constant 0 : index
    %c0_65 = arith.constant 0 : index
    %130 = vector.load %arg2[%129, %c0_64, %c0_65] : memref<8x8x128xf32, #tpu.memory_space<vmem>>, vector<1x8x128xf32>
    %131 = vector.shape_cast %130 : vector<1x8x128xf32> to vector<8x128xf32>
    %132 = arith.addf %128, %131 : vector<8x128xf32>
    %cst_66 = arith.constant 0.000000e+00 : f32
    %133 = vector.broadcast %cst_66 : f32 to vector<8x128xf32>
    %134 = arith.maximumf %132, %133 : vector<8x128xf32>
    %cst_67 = arith.constant 3.000000e-01 : f32
    %135 = vector.broadcast %cst_67 : f32 to vector<8x128xf32>
    %136 = arith.mulf %135, %134 : vector<8x128xf32>
    %137 = arith.mulf %136, %134 : vector<8x128xf32>
    %138 = arith.index_cast %c7_i32 : i32 to index
    %c0_68 = arith.constant 0 : index
    %c0_69 = arith.constant 0 : index
    %139 = vector.load %arg10[%138, %c0_68, %c0_69] : memref<8x8x128xf32, #tpu.memory_space<vmem>>, vector<1x8x128xf32>
    %140 = vector.shape_cast %139 : vector<1x8x128xf32> to vector<8x128xf32>
    %141 = vector.shape_cast %137 : vector<8x128xf32> to vector<1x8x128xf32>
    tpu.vector_store %arg10[%138, %c0_68, %c0_69], %141 {strides = array<i32>} : memref<8x8x128xf32, #tpu.memory_space<vmem>>, vector<1x8x128xf32>,
    %c8_i32 = arith.constant 8 : i32
    %c0_70 = arith.constant 0 : index
    %c0_71 = arith.constant 0 : index
    %142 = vector.load %arg8[%c0_70, %c0_71] : memref<8x128xf32, #tpu.memory_space<vmem>>, vector<8x128xf32>
    tpu.vector_store %arg8[%c0_70, %c0_71], %132 {strides = array<i32>} : memref<8x128xf32, #tpu.memory_space<vmem>>, vector<8x128xf32>,
    %c0_72 = arith.constant 0 : index
    %c0_73 = arith.constant 0 : index
    %143 = vector.load %arg9[%c0_72, %c0_73] : memref<8x128xf32, #tpu.memory_space<vmem>>, vector<8x128xf32>
    tpu.vector_store %arg9[%c0_72, %c0_73], %137 {strides = array<i32>} : memref<8x128xf32, #tpu.memory_space<vmem>>, vector<8x128xf32>,
    %c0_74 = arith.constant 0 : index
    %c0_75 = arith.constant 0 : index
    %c0_76 = arith.constant 0 : index
    %144 = vector.load %arg10[%c0_74, %c0_75, %c0_76] : memref<8x8x128xf32, #tpu.memory_space<vmem>>, vector<8x8x128xf32>
    %145 = vector.shape_cast %144 : vector<8x8x128xf32> to vector<64x128xf32>
    %c0_77 = arith.constant 0 : index
    %c0_78 = arith.constant 0 : index
    %146 = vector.load %arg4[%c0_77, %c0_78] : memref<128x128xf32, #tpu.memory_space<vmem>>, vector<128x128xf32>
    %cst_79 = arith.constant dense<0.000000e+00> : vector<64x128xf32>
    %147 = tpu.matmul %145, %146, %cst_79 {dimension_numbers = #tpu.dot_dimension_numbers<[1], [0], [0], [1], [0, 0, 1, 1], [], []>} : vector<64x128xf32>, vector<128x128xf32>, vector<64x128xf32> -> vector<64x128xf32>
    %148 = vector.shape_cast %147 : vector<64x128xf32> to vector<8x8x128xf32>
    %c0_80 = arith.constant 0 : index
    %c0_81 = arith.constant 0 : index
    %149 = vector.load %arg5[%c0_80, %c0_81] : memref<1x128xf32, #tpu.memory_space<vmem>>, vector<1x128xf32>
    %150 = vector.shape_cast %149 : vector<1x128xf32> to vector<1x1x128xf32>
    %151 = vector.broadcast %150 : vector<1x1x128xf32> to vector<8x8x128xf32>
    %152 = arith.addf %148, %151 : vector<8x8x128xf32>
    %c0_82 = arith.constant 0 : index
    %c0_83 = arith.constant 0 : index
    %c0_84 = arith.constant 0 : index
    %153 = vector.load %arg7[%c0_82, %c0_83, %c0_84] : memref<8x8x128xf32, #tpu.memory_space<vmem>>, vector<8x8x128xf32>
    tpu.vector_store %arg7[%c0_82, %c0_83, %c0_84], %152 {strides = array<i32>} : memref<8x8x128xf32, #tpu.memory_space<vmem>>, vector<8x8x128xf32>,
    return
  }
  func.func @transform_0(%arg0: i32, %arg1: i32) -> (i32, i32, i32) {
    %c0_i32 = arith.constant 0 : i32
    %c0_i32_0 = arith.constant 0 : i32
    return %arg1, %arg0, %c0_i32 : i32, i32, i32
  }
  func.func @transform_1(%arg0: i32, %arg1: i32) -> (i32, i32) {
    %c0_i32 = arith.constant 0 : i32
    %c0_i32_0 = arith.constant 0 : i32
    %c0_i32_1 = arith.constant 0 : i32
    return %c0_i32, %c0_i32_0 : i32, i32
  }
  func.func @transform_2(%arg0: i32, %arg1: i32) -> (i32, i32) {
    %c0_i32 = arith.constant 0 : i32
    %c0_i32_0 = arith.constant 0 : i32
    %c0_i32_1 = arith.constant 0 : i32
    return %c0_i32, %c0_i32_0 : i32, i32
  }
  func.func @transform_3(%arg0: i32, %arg1: i32) -> (i32, i32) {
    %c0_i32 = arith.constant 0 : i32
    %c0_i32_0 = arith.constant 0 : i32
    %c0_i32_1 = arith.constant 0 : i32
    return %c0_i32, %c0_i32_0 : i32, i32
  }
  func.func @transform_4(%arg0: i32, %arg1: i32) -> (i32, i32) {
    %c0_i32 = arith.constant 0 : i32
    %c0_i32_0 = arith.constant 0 : i32
    return %arg0, %c0_i32 : i32, i32
  }
  func.func @transform_5(%arg0: i32, %arg1: i32) -> (i32, i32, i32) {
    %c0_i32 = arith.constant 0 : i32
    %c0_i32_0 = arith.constant 0 : i32
    return %arg1, %arg0, %c0_i32 : i32, i32, i32
  }
}

</mosaic_0001>

<bundles_post_ra>
// kernel: tpu_custom_call.1
= control target key start
LH: loop header
LB: loop body
LE: loop exit
PB: predicated region body
PF: predicated region fallthrough
CT: control target
= control target key end

     0   :  { %10 = vsyncpa [#allocation6], 0  ;;  %s2104_s0 = inlined_call_operand.hbm [shape: f32[8,8,128], index: 0, kind: input, shape index: {}]   ;;  %s2105_s1 = inlined_call_operand.hbm [shape: f32[128,128], index: 1, kind: input, shape index: {}]   ;;  %s2106_s2 = inlined_call_operand.hbm [shape: f32[128,128], index: 2, kind: input, shape index: {}]   ;;  %s2107_s3 = inlined_call_operand.hbm [shape: f32[1,128], index: 3, kind: input, shape index: {}]   ;;  %s2108_s4 = inlined_call_operand.hbm [shape: f32[8,128], index: 4, kind: input, shape index: {}]   ;;  %s2109_s5 = inlined_call_operand.hbm [shape: f32[8,8,128], index: 5, kind: output, shape index: {}]  }
   0x1   :  { %11 = vsyncpa [#allocation9], 0 }
   0x2   :  { %12 = vsyncpa [#allocation12], 0 }
   0x3   :  { %13 = vsyncpa [#allocation7], 0  ;;  %s1784_s18 = smov [#allocation8]   ;;  %s1785_s20 = smov [#allocation11]  }
   0x4   :  { %s31_s19 = sshll.u32 %s1784_s18, 4  ;;  %s56_s21 = sshll.u32 %s1785_s20, 4  ;;  %s32_s19 = int_to_ptr.vmem [resolvable:$true] %s31_s19  ;;  %s1825_s21 = int_to_ptr.vmem [resolvable:$true] %s56_s21 }
   0x5   :  { %s1644_s24 = scalar_lea.hbm %s2105_s1, 2048 }
   0x6   :  { %p1645_p0 = scmp.ne.s32.totalorder %s2105_s1, %s1644_s24  ;;  %p1648_p1 = scmp.lt.u32.totalorder %s1644_s24, %s2105_s1 }
   0x8   :  { %p1650_p2 = pnand %p1648_p1, %p1645_p0 }
   0xa   :  { %1653 = shalt.err (!%p1650_p2)
}
   0xb   :  { %s1654_s29 = scalar_lea.vmem %s32_s19, 2048  ;;  %p1659_p4 = scmp.lt.s32.totalorder %s32_s19, %s32_s19 }
   0xc   :  { %p1655_p3 = scmp.ne.s32.totalorder %s32_s19, %s1654_s29  ;;  %p1660_p5 = scmp.lt.s32.totalorder %s1654_s29, %s1654_s29 }
   0xe   :  { %p1661_p6 = por %p1660_p5, %p1659_p4 }
  0x10   :  { %p1662_p7 = pnand %p1661_p6, %p1655_p3 }
  0x12   :  { %1665 = shalt.err (!%p1662_p7)
}
  0x13   :  { %s1786_s30 = smov 128   ;;  %s1787_s6 = smov 8  }
  0x14   :  { %37 = dma.hbm_to_vmem [thread:$0]  %s2105_s1, 2048, %s32_s19, [#allocation9], %s1786_s30, %s1786_s30, %s1787_s6  }
  0x15   :  { %s1666_s11 = scalar_lea.hbm %s2107_s3, 16 }
  0x16   :  { %p1667_p8 = scmp.ne.s32.totalorder %s2107_s3, %s1666_s11  ;;  %p1670_p9 = scmp.lt.u32.totalorder %s1666_s11, %s2107_s3 }
  0x18   :  { %p1672_p10 = pnand %p1670_p9, %p1667_p8 }
  0x1a   :  { %1675 = shalt.err (!%p1672_p10)
}
  0x1b   :  { %s1676_s16 = scalar_lea.vmem %s1825_s21, 16  ;;  %s1680_s1 = scalar_lea.vmem %s1825_s21, 32 }
  0x1c   :  { %p1677_p11 = scmp.ne.s32.totalorder %s1825_s21, %s1676_s16  ;;  %p1681_p12 = scmp.lt.s32.totalorder %s1825_s21, %s1825_s21 }
  0x1d   :  { %p1682_p13 = scmp.lt.s32.totalorder %s1680_s1, %s1676_s16 }
  0x1f   :  { %p1683_p0 = por %p1682_p13, %p1681_p12 }
  0x21   :  { %p1684_p1 = pnand %p1683_p0, %p1677_p11 }
  0x23   :  { %1687 = shalt.err (!%p1684_p1)
}
  0x24   :  { %59 = dma.hbm_to_vmem [thread:$0]  %s2107_s3, 16, %s1825_s21, [#allocation12]  }
  0x25   :  { %s1788_s19 = smov [#allocation5]   ;;  %s1789_s22 = smov [#allocation10]  }
  0x26   :  { %s19_s20 = sshll.u32 %s1788_s19, 4  ;;  %s43_s23 = sshll.u32 %s1789_s22, 4  ;;  %s20_s20 = int_to_ptr.vmem [resolvable:$true] %s19_s20  ;;  %s1860_s23 = int_to_ptr.vmem [resolvable:$true] %s43_s23 }
  0x27   :  { %s1688_s26 = scalar_lea.hbm %s2104_s0, 1024 }
  0x28   :  { %p1689_p2 = scmp.ne.s32.totalorder %s2104_s0, %s1688_s26  ;;  %p1692_p3 = scmp.lt.u32.totalorder %s1688_s26, %s2104_s0 }
  0x2a   :  { %p1694_p4 = pnand %p1692_p3, %p1689_p2 }
  0x2c   :  { %1697 = shalt.err (!%p1694_p4)
}
  0x2d   :  { %s1698_s3 = scalar_lea.vmem %s20_s20, 1024  ;;  %p1703_p6 = scmp.lt.s32.totalorder %s20_s20, %s20_s20 }
  0x2e   :  { %p1699_p5 = scmp.ne.s32.totalorder %s20_s20, %s1698_s3  ;;  %p1704_p7 = scmp.lt.s32.totalorder %s1698_s3, %s1698_s3 }
  0x30   :  { %p1705_p8 = por %p1704_p7, %p1703_p6 }
  0x32   :  { %p1706_p9 = pnand %p1705_p8, %p1699_p5 }
  0x34   :  { %1709 = shalt.err (!%p1706_p9)
}
  0x35   :  { %25 = dma.hbm_to_vmem [thread:$0]  %s2104_s0, 1024, %s20_s20, [#allocation6], %s1786_s30, %s1786_s30, %s1787_s6  }
  0x36   :  { %s1710_s11 = scalar_lea.hbm %s2106_s2, 2048 }
  0x37   :  { %p1711_p10 = scmp.ne.s32.totalorder %s2106_s2, %s1710_s11  ;;  %p1714_p11 = scmp.lt.u32.totalorder %s1710_s11, %s2106_s2 }
  0x39   :  { %p1716_p12 = pnand %p1714_p11, %p1711_p10 }
  0x3b   :  { %1719 = shalt.err (!%p1716_p12)
}
  0x3c   :  { %s1720_s16 = scalar_lea.vmem %s1860_s23, 2048  ;;  %p1725_p0 = scmp.lt.s32.totalorder %s1860_s23, %s1860_s23 }
  0x3d   :  { %p1721_p13 = scmp.ne.s32.totalorder %s1860_s23, %s1720_s16  ;;  %p1726_p1 = scmp.lt.s32.totalorder %s1720_s16, %s1720_s16 }
  0x3f   :  { %p1727_p2 = por %p1726_p1, %p1725_p0 }
  0x41   :  { %p1728_p3 = pnand %p1727_p2, %p1721_p13 }
  0x43   :  { %1731 = shalt.err (!%p1728_p3)
}
  0x44   :  { %49 = dma.hbm_to_vmem [thread:$0]  %s2106_s2, 2048, %s1860_s23, [#allocation9], %s1786_s30, %s1786_s30, %s1787_s6  }
  0x45   :  { %s1790_s17 = smov [#allocation13]   ;;  %s1732_s22 = scalar_lea.hbm %s2108_s4, 128 }
  0x46   :  { %s66_s18 = sshll.u32 %s1790_s17, 4  ;;  %p1733_p4 = scmp.ne.s32.totalorder %s2108_s4, %s1732_s22  ;;  %s67_s18 = int_to_ptr.vmem [resolvable:$true] %s66_s18 }
  0x47   :  { %p1736_p5 = scmp.lt.u32.totalorder %s1732_s22, %s2108_s4 }
  0x49   :  { %p1738_p6 = pnand %p1736_p5, %p1733_p4 }
  0x4b   :  { %1741 = shalt.err (!%p1738_p6)
}
  0x4c   :  { %s1742_s28 = scalar_lea.vmem %s67_s18, 128  ;;  %p1747_p8 = scmp.lt.s32.totalorder %s67_s18, %s67_s18 }
  0x4d   :  { %p1743_p7 = scmp.ne.s32.totalorder %s67_s18, %s1742_s28  ;;  %p1748_p9 = scmp.lt.s32.totalorder %s1742_s28, %s1742_s28 }
  0x4f   :  { %p1749_p10 = por %p1748_p9, %p1747_p8 }
  0x51   :  { %p1750_p11 = pnand %p1749_p10, %p1743_p7 }
  0x53   :  { %1753 = shalt.err (!%p1750_p11)
}
  0x54   :  { %69 = dma.hbm_to_vmem [thread:$0]  %s2108_s4, 128, %s67_s18, [#allocation12]  }
  0x55   :  { %1776 = dma.done.wait [#allocation6], 1024  }
  0x56   :  { %1777 = vsyncadd [#allocation6], 4294966272 }
  0x57   :  { %1778 = dma.done.wait [#allocation9], 4096  }
  0x58   :  { %1779 = vsyncadd [#allocation9], 4294963200 }
  0x59   :  { %1780 = dma.done.wait [#allocation12], 144  }
  0x5a   :  { %1781 = vsyncadd [#allocation12], 4294967152  ;;  %v1791_v0 = vmov 0.0|0.0   ;;  %vm1792_vm0 = vmmov 0   ;;  %v1793_v1 = vmov 0.0   ;;  %v95_v2 = vld [vmem:[#allocation8] sm:$0xff] }
  0x5b   :  { %1409 = vmatprep.subr.bf16.mxu1 %v1791_v0  ;;  %1117 = vmatprep.mubr.msk.f32.mxu1 %vm1792_vm0, %v1793_v1  ;;  %v96_v3 = vld [vmem:[#allocation8 + $0x8] sm:$0xff]  ;;  %v97_v4 = vld [vmem:[#allocation8 + $0x10] sm:$0xff]  ;;  %v98_v6 = vld [vmem:[#allocation8 + $0x18] sm:$0xff]  ;;  %s1794_s4 = smov [#allocation14]  }
  0x5c   :  { %1457 = vmatprep.subr.bf16.mxu0 %v1791_v0  ;;  %1187 = vmatprep.mubr.msk.f32.mxu0 %vm1792_vm0, %v1793_v1  ;;  %v1915_v5 = vpack.c.bf16 %v96_v3, %v95_v2  ;;  %v1918_v7 = vpack.c.bf16 %v98_v6, %v97_v4  ;;  %v99_v8 = vld [vmem:[#allocation8 + $0x20] sm:$0xff]  ;;  %v100_v9 = vld [vmem:[#allocation8 + $0x28] sm:$0xff]  ;;  %v101_v11 = vld [vmem:[#allocation8 + $0x30] sm:$0xff]  ;;  %s910_s29 = sshll.u32 %s1794_s4, 4  ;;  %s911_s29 = int_to_ptr.vmem [resolvable:$true] %s910_s29 }
  0x5d   :  { %v1924_v10 = vpack.c.bf16 %v100_v9, %v99_v8  ;;  %v102_v12 = vld [vmem:[#allocation8 + $0x38] sm:$0xff]  ;;  %v103_v14 = vld [vmem:[#allocation8 + $0x40] sm:$0xff]  ;;  %v104_v15 = vld [vmem:[#allocation8 + $0x48] sm:$0xff]  ;;  %s1754_s7 = scalar_lea.vmem %s911_s29, 1024  ;;  %p1759_p13 = scmp.lt.s32.totalorder %s911_s29, %s911_s29 }
  0x5e   :  { %1411 = vmatpush3.bf16.msra.mxu1 %v1915_v5  ;;  %1459 = vmatpush3.bf16.msra.mxu0 %v1915_v5  ;;  %v1930_v13 = vpack.c.bf16 %v102_v12, %v101_v11  ;;  %v1936_v16 = vpack.c.bf16 %v104_v15, %v103_v14  ;;  %v105_v17 = vld [vmem:[#allocation8 + $0x50] sm:$0xff]  ;;  %v106_v18 = vld [vmem:[#allocation8 + $0x58] sm:$0xff]  ;;  %v89_v20 = vld [vmem:[#allocation13] sm:$0xff]  ;;  %p1755_p12 = scmp.ne.s32.totalorder %s911_s29, %s1754_s7  ;;  %p1760_p0 = scmp.lt.s32.totalorder %s1754_s7, %s1754_s7 }
  0x5f   :  { %1412 = vmatprep.subr.bf16.mxu1 %v1791_v0  ;;  %1460 = vmatprep.subr.bf16.mxu0 %v1791_v0  ;;  %v1942_v19 = vpack.c.bf16 %v106_v18, %v105_v17  ;;  %v107_v21 = vld [vmem:[#allocation8 + $0x60] sm:$0xff]  ;;  %v108_v22 = vld [vmem:[#allocation8 + $0x68] sm:$0xff]  ;;  %v91_v23 = vmax.f32 %v89_v20, 0.0  ;;  %v109_v25 = vld [vmem:[#allocation8 + $0x70] sm:$0xff]  ;;  %v183_v30 = vmul.f32 0.9, %v89_v20 }
  0x60   :  { %v1948_v24 = vpack.c.bf16 %v108_v22, %v107_v21  ;;  %v110_v26 = vld [vmem:[#allocation8 + $0x78] sm:$0xff]  ;;  %v185_v32 = vld [vmem:[#allocation5] sm:$0xff]  ;;  %v264_v41 = vld [vmem:[#allocation5 + $0x8] sm:$0xff]  ;;  %p1761_p1 = por %p1760_p0, %p1759_p13 }
  0x61   :  { %v92_v27 = vmul.f32 0.3, %v91_v23  ;;  %v1954_v28 = vpack.c.bf16 %v110_v26, %v109_v25  ;;  %v344_v50 = vld [vmem:[#allocation5 + $0x10] sm:$0xff]  ;;  %v424_v59 = vld [vmem:[#allocation5 + $0x18] sm:$0xff]  ;;  %v504_v8 = vld [vmem:[#allocation5 + $0x20] sm:$0xff] }
  0x62   :  { %1414 = vmatpush3.bf16.msra.mxu1 %v1918_v7  ;;  %1462 = vmatpush3.bf16.msra.mxu0 %v1918_v7  ;;  %v584_v18 = vld [vmem:[#allocation5 + $0x28] sm:$0xff]  ;;  %p1762_p2 = pnand %p1761_p1, %p1755_p12 }
  0x63   :  { %1415 = vmatprep.subr.bf16.mxu1 %v1791_v0  ;;  %1463 = vmatprep.subr.bf16.mxu0 %v1791_v0  ;;  %v93_v29 = vmul.f32 %v92_v27, %v91_v23  ;;  %v764_v23 = vld [vmem:[#allocation10 + $0x18] sm:$0xff]  ;;  %v765_v27 = vld [vmem:[#allocation10 + $0x20] sm:$0xff] }
  0x66   :  { %1417 = vmatpush3.bf16.msra.mxu1 %v1924_v10  ;;  %1465 = vmatpush3.bf16.msra.mxu0 %v1924_v10 }
  0x67   :  { %1418 = vmatprep.subr.bf16.mxu1 %v1791_v0  ;;  %1466 = vmatprep.subr.bf16.mxu0 %v1791_v0 }
  0x6a   :  { %1420 = vmatpush3.bf16.msra.mxu1 %v1930_v13  ;;  %1468 = vmatpush3.bf16.msra.mxu0 %v1930_v13 }
  0x6b   :  { %1421 = vmatprep.subr.bf16.mxu1 %v1791_v0  ;;  %1469 = vmatprep.subr.bf16.mxu0 %v1791_v0 }
  0x6e   :  { %1423 = vmatpush3.bf16.msra.mxu1 %v1936_v16  ;;  %1471 = vmatpush3.bf16.msra.mxu0 %v1936_v16 }
  0x6f   :  { %1424 = vmatprep.subr.bf16.mxu1 %v1791_v0  ;;  %1472 = vmatprep.subr.bf16.mxu0 %v1791_v0 }
  0x72   :  { %1426 = vmatpush3.bf16.msra.mxu1 %v1942_v19  ;;  %1474 = vmatpush3.bf16.msra.mxu0 %v1942_v19 }
  0x73   :  { %1427 = vmatprep.subr.bf16.mxu1 %v1791_v0  ;;  %1475 = vmatprep.subr.bf16.mxu0 %v1791_v0 }
  0x76   :  { %1429 = vmatpush3.bf16.msra.mxu1 %v1948_v24  ;;  %1477 = vmatpush3.bf16.msra.mxu0 %v1948_v24 }
  0x77   :  { %1430 = vmatprep.subr.bf16.mxu1 %v1791_v0  ;;  %1478 = vmatprep.subr.bf16.mxu0 %v1791_v0 }
  0x7a   :  { %1432 = vmatpush3.bf16.msra.mxu1 %v1954_v28  ;;  %1480 = vmatpush3.bf16.msra.mxu0 %v1954_v28 }
  0x7b   :  { %1433 = vmatprep.subr.bf16.mxu1 %v1791_v0  ;;  %1505 = vmatprep.subr.bf16.mxu0 %v1791_v0 }
  0x7d   :  { %1118 = vmatmul.mubr.f32.vlgmr.msra.gmra.mrb[0].mxu1 %v93_v29  ;;  %v767_v29 = vld [vmem:[#allocation10 + $0x30] sm:$0xff] }
  0x7e   :  { %1435 = vmatpush3.bf16.msra.mxu1 %v1915_v5  ;;  %1152 = vmatprep.mubr.msk.f32.mxu1 %vm1792_vm0, %v1793_v1 }
  0x7f   :  { %1436 = vmatprep.subr.bf16.mxu1 %v1791_v0 }
  0x82   :  { %1438 = vmatpush3.bf16.msra.mxu1 %v1918_v7 }
  0x83   :  { %1439 = vmatprep.subr.bf16.mxu1 %v1791_v0 }
  0x86   :  { %1441 = vmatpush3.bf16.msra.mxu1 %v1924_v10 }
  0x87   :  { %1442 = vmatprep.subr.bf16.mxu1 %v1791_v0 }
  0x8a   :  { %1444 = vmatpush3.bf16.msra.mxu1 %v1930_v13 }
  0x8b   :  { %1445 = vmatprep.subr.bf16.mxu1 %v1791_v0 }
  0x8e   :  { %1447 = vmatpush3.bf16.msra.mxu1 %v1936_v16 }
  0x8f   :  { %1448 = vmatprep.subr.bf16.mxu1 %v1791_v0 }
  0x92   :  { %1450 = vmatpush3.bf16.msra.mxu1 %v1942_v19 }
  0x93   :  { %1451 = vmatprep.subr.bf16.mxu1 %v1791_v0 }
  0x96   :  { %1453 = vmatpush3.bf16.msra.mxu1 %v1948_v24 }
  0x97   :  { %1454 = vmatprep.subr.bf16.mxu1 %v1791_v0 }
  0x9a   :  { %1456 = vmatpush3.bf16.msra.mxu1 %v1954_v28 }
  0x9b   :  { %1481 = vmatprep.subr.bf16.mxu1 %v1791_v0 }
 0x150   :  { %v179_v31 = vpop.f32.mrb[0].mxu1 }
 0x151   :  { %v184_v33 = vadd.f32 %v183_v30, %v179_v31  ;;  %v1119_v34 = vpop.f32.mrb[1].mxu1  ;;  %v768_v30 = vld [vmem:[#allocation10 + $0x38] sm:$0xff] }
 0x152   :  { %v1613_v31 = vpack.c.bf16 %v768_v30, %v767_v29 }
 0x153   :  { %v186_v35 = vadd.f32 %v185_v32, %v184_v33  ;;  %v769_v32 = vld [vmem:[#allocation10 + $0x40] sm:$0xff]  ;;  %v770_v33 = vld [vmem:[#allocation10 + $0x48] sm:$0xff] }
 0x154   :  { %v1617_v34 = vpack.c.bf16 %v770_v33, %v769_v32 }
 0x155   :  { %v187_v36 = vmax.f32 %v186_v35, 0.0  ;;  %v261_v39 = vmul.f32 0.9, %v186_v35  ;;  %v771_v35 = vld [vmem:[#allocation10 + $0x50] sm:$0xff] }
 0x157   :  { %v188_v37 = vmul.f32 0.3, %v187_v36 }
 0x159   :  { %v1981_v38 = vmul.f32 %v188_v37, %v187_v36  ;;  %v772_v36 = vld [vmem:[#allocation10 + $0x58] sm:$0xff] }
 0x15a   :  { %v1621_v37 = vpack.c.bf16 %v772_v36, %v771_v35 }
 0x15b   :  { %1153 = vmatmul.mubr.f32.vlgmr.msra.gmra.mrb[2].mxu1 %v1981_v38 }
 0x15c   :  { %1483 = vmatpush3.bf16.msra.mxu1 %v1915_v5  ;;  %1222 = vmatprep.mubr.msk.f32.mxu1 %vm1792_vm0, %v1793_v1 }
 0x15d   :  { %1484 = vmatprep.subr.bf16.mxu1 %v1791_v0 }
 0x160   :  { %1486 = vmatpush3.bf16.msra.mxu1 %v1918_v7 }
 0x161   :  { %1487 = vmatprep.subr.bf16.mxu1 %v1791_v0 }
 0x164   :  { %1489 = vmatpush3.bf16.msra.mxu1 %v1924_v10 }
 0x165   :  { %1490 = vmatprep.subr.bf16.mxu1 %v1791_v0 }
 0x168   :  { %1492 = vmatpush3.bf16.msra.mxu1 %v1930_v13 }
 0x169   :  { %1493 = vmatprep.subr.bf16.mxu1 %v1791_v0 }
 0x16c   :  { %1495 = vmatpush3.bf16.msra.mxu1 %v1936_v16 }
 0x16d   :  { %1496 = vmatprep.subr.bf16.mxu1 %v1791_v0 }
 0x170   :  { %1498 = vmatpush3.bf16.msra.mxu1 %v1942_v19 }
 0x171   :  { %1499 = vmatprep.subr.bf16.mxu1 %v1791_v0 }
 0x174   :  { %1501 = vmatpush3.bf16.msra.mxu1 %v1948_v24 }
 0x175   :  { %1502 = vmatprep.subr.bf16.mxu1 %v1791_v0 }
 0x178   :  { %1504 = vmatpush3.bf16.msra.mxu1 %v1954_v28 }
 0x179   :  { %1529 = vmatprep.subr.bf16.mxu1 %v1791_v0 }
 0x22e   :  { %v257_v40 = vpop.f32.mrb[2].mxu1 }
 0x22f   :  { %v262_v42 = vadd.f32 %v261_v39, %v257_v40  ;;  %v1154_v43 = vpop.f32.mrb[3].mxu1  ;;  %v773_v39 = vld [vmem:[#allocation10 + $0x60] sm:$0xff]  ;;  %v774_v40 = vld [vmem:[#allocation10 + $0x68] sm:$0xff] }
 0x231   :  { %v265_v44 = vadd.f32 %v264_v41, %v262_v42  ;;  %v775_v41 = vld [vmem:[#allocation10 + $0x70] sm:$0xff]  ;;  %v776_v42 = vld [vmem:[#allocation10 + $0x78] sm:$0xff] }
 0x232   :  { %v1629_v43 = vpack.c.bf16 %v776_v42, %v775_v41 }
 0x233   :  { %v266_v45 = vmax.f32 %v265_v44, 0.0  ;;  %v341_v48 = vmul.f32 0.9, %v265_v44 }
 0x235   :  { %v267_v46 = vmul.f32 0.3, %v266_v45 }
 0x237   :  { %v2002_v47 = vmul.f32 %v267_v46, %v266_v45  ;;  %v664_v46 = vld [vmem:[#allocation5 + $0x30] sm:$0xff] }
 0x239   :  { %1188 = vmatmul.mubr.f32.vlgmr.msra.gmra.mrb[0].mxu0 %v2002_v47 }
 0x23a   :  { %1507 = vmatpush3.bf16.msra.mxu0 %v1915_v5  ;;  %1257 = vmatprep.mubr.msk.f32.mxu0 %vm1792_vm0, %v1793_v1 }
 0x23b   :  { %1508 = vmatprep.subr.bf16.mxu0 %v1791_v0 }
 0x23e   :  { %1510 = vmatpush3.bf16.msra.mxu0 %v1918_v7 }
 0x23f   :  { %1511 = vmatprep.subr.bf16.mxu0 %v1791_v0 }
 0x242   :  { %1513 = vmatpush3.bf16.msra.mxu0 %v1924_v10 }
 0x243   :  { %1514 = vmatprep.subr.bf16.mxu0 %v1791_v0 }
 0x246   :  { %1516 = vmatpush3.bf16.msra.mxu0 %v1930_v13 }
 0x247   :  { %1517 = vmatprep.subr.bf16.mxu0 %v1791_v0 }
 0x24a   :  { %1519 = vmatpush3.bf16.msra.mxu0 %v1936_v16 }
 0x24b   :  { %1520 = vmatprep.subr.bf16.mxu0 %v1791_v0 }
 0x24e   :  { %1522 = vmatpush3.bf16.msra.mxu0 %v1942_v19 }
 0x24f   :  { %1523 = vmatprep.subr.bf16.mxu0 %v1791_v0 }
 0x252   :  { %1525 = vmatpush3.bf16.msra.mxu0 %v1948_v24 }
 0x253   :  { %1526 = vmatprep.subr.bf16.mxu0 %v1791_v0 }
 0x256   :  { %1528 = vmatpush3.bf16.msra.mxu0 %v1954_v28 }
 0x257   :  { %1553 = vmatprep.subr.bf16.mxu0 %v1791_v0 }
 0x30c   :  { %v337_v49 = vpop.f32.mrb[0].mxu0 }
 0x30d   :  { %v342_v51 = vadd.f32 %v341_v48, %v337_v49  ;;  %v1189_v52 = vpop.f32.mrb[1].mxu0 }
 0x30f   :  { %v345_v53 = vadd.f32 %v344_v50, %v342_v51 }
 0x311   :  { %v346_v54 = vmax.f32 %v345_v53, 0.0  ;;  %v421_v57 = vmul.f32 0.9, %v345_v53 }
 0x313   :  { %v347_v55 = vmul.f32 0.3, %v346_v54 }
 0x315   :  { %v2023_v56 = vmul.f32 %v347_v55, %v346_v54  ;;  %v924_v54 = vld [vmem:[#allocation11] ss:$0 sm:$0xff] }
 0x317   :  { %1223 = vmatmul.mubr.f32.vlgmr.msra.gmra.mrb[4].mxu1 %v2023_v56 }
 0x318   :  { %1531 = vmatpush3.bf16.msra.mxu1 %v1915_v5  ;;  %1292 = vmatprep.mubr.msk.f32.mxu1 %vm1792_vm0, %v1793_v1 }
 0x319   :  { %1532 = vmatprep.subr.bf16.mxu1 %v1791_v0 }
 0x31c   :  { %1534 = vmatpush3.bf16.msra.mxu1 %v1918_v7 }
 0x31d   :  { %1535 = vmatprep.subr.bf16.mxu1 %v1791_v0 }
 0x320   :  { %1537 = vmatpush3.bf16.msra.mxu1 %v1924_v10 }
 0x321   :  { %1538 = vmatprep.subr.bf16.mxu1 %v1791_v0 }
 0x324   :  { %1540 = vmatpush3.bf16.msra.mxu1 %v1930_v13 }
 0x325   :  { %1541 = vmatprep.subr.bf16.mxu1 %v1791_v0 }
 0x328   :  { %1543 = vmatpush3.bf16.msra.mxu1 %v1936_v16 }
 0x329   :  { %1544 = vmatprep.subr.bf16.mxu1 %v1791_v0 }
 0x32c   :  { %1546 = vmatpush3.bf16.msra.mxu1 %v1942_v19 }
 0x32d   :  { %1547 = vmatprep.subr.bf16.mxu1 %v1791_v0 }
 0x330   :  { %1549 = vmatpush3.bf16.msra.mxu1 %v1948_v24 }
 0x331   :  { %1550 = vmatprep.subr.bf16.mxu1 %v1791_v0 }
 0x334   :  { %1552 = vmatpush3.bf16.msra.mxu1 %v1954_v28 }
 0x335   :  { %1577 = vmatprep.subr.bf16.mxu1 %v1791_v0 }
 0x3ea   :  { %v417_v58 = vpop.f32.mrb[4].mxu1 }
 0x3eb   :  { %v422_v60 = vadd.f32 %v421_v57, %v417_v58  ;;  %v1224_v61 = vpop.f32.mrb[5].mxu1 }
 0x3ed   :  { %v425_v62 = vadd.f32 %v424_v59, %v422_v60 }
 0x3ef   :  { %v426_v63 = vmax.f32 %v425_v62, 0.0  ;;  %v501_v4 = vmul.f32 0.9, %v425_v62 }
 0x3f1   :  { %v427_v2 = vmul.f32 0.3, %v426_v63 }
 0x3f3   :  { %v2044_v3 = vmul.f32 %v427_v2, %v426_v63 }
 0x3f5   :  { %1258 = vmatmul.mubr.f32.vlgmr.msra.gmra.mrb[2].mxu0 %v2044_v3 }
 0x3f6   :  { %1555 = vmatpush3.bf16.msra.mxu0 %v1915_v5  ;;  %1327 = vmatprep.mubr.msk.f32.mxu0 %vm1792_vm0, %v1793_v1 }
 0x3f7   :  { %1556 = vmatprep.subr.bf16.mxu0 %v1791_v0 }
 0x3fa   :  { %1558 = vmatpush3.bf16.msra.mxu0 %v1918_v7 }
 0x3fb   :  { %1559 = vmatprep.subr.bf16.mxu0 %v1791_v0 }
 0x3fe   :  { %1561 = vmatpush3.bf16.msra.mxu0 %v1924_v10 }
 0x3ff   :  { %1562 = vmatprep.subr.bf16.mxu0 %v1791_v0 }
 0x402   :  { %1564 = vmatpush3.bf16.msra.mxu0 %v1930_v13 }
 0x403   :  { %1565 = vmatprep.subr.bf16.mxu0 %v1791_v0 }
 0x406   :  { %1567 = vmatpush3.bf16.msra.mxu0 %v1936_v16 }
 0x407   :  { %1568 = vmatprep.subr.bf16.mxu0 %v1791_v0 }
 0x40a   :  { %1570 = vmatpush3.bf16.msra.mxu0 %v1942_v19 }
 0x40b   :  { %1571 = vmatprep.subr.bf16.mxu0 %v1791_v0 }
 0x40e   :  { %1573 = vmatpush3.bf16.msra.mxu0 %v1948_v24 }
 0x40f   :  { %1574 = vmatprep.subr.bf16.mxu0 %v1791_v0 }
 0x412   :  { %1576 = vmatpush3.bf16.msra.mxu0 %v1954_v28 }
 0x4c8   :  { %v497_v6 = vpop.f32.mrb[2].mxu0 }
 0x4c9   :  { %v502_v9 = vadd.f32 %v501_v4, %v497_v6  ;;  %v1259_v11 = vpop.f32.mrb[3].mxu0 }
 0x4cb   :  { %v505_v12 = vadd.f32 %v504_v8, %v502_v9  ;;  %v744_v8 = vld [vmem:[#allocation5 + $0x38] sm:$0xff] }
 0x4cd   :  { %v506_v14 = vmax.f32 %v505_v12, 0.0 }
 0x4cf   :  { %v507_v15 = vmul.f32 0.3, %v506_v14 }
 0x4d1   :  { %v2064_v17 = vmul.f32 %v507_v15, %v506_v14 }
 0x4d3   :  { %1293 = vmatmul.mubr.f32.vlgmr.msra.gmra.mrb[6].mxu1 %v2064_v17 }
 0x4d4   :  { %1579 = vmatpush3.bf16.msra.mxu1 %v1915_v5  ;;  %1362 = vmatprep.mubr.msk.f32.mxu1 %vm1792_vm0, %v1793_v1  ;;  %v761_v1 = vld [vmem:[#allocation10] sm:$0xff]  ;;  %v762_v5 = vld [vmem:[#allocation10 + $0x8] sm:$0xff] }
 0x4d5   :  { %1580 = vmatprep.subr.bf16.mxu1 %v1791_v0 }
 0x4d8   :  { %1582 = vmatpush3.bf16.msra.mxu1 %v1918_v7  ;;  %v1601_v7 = vpack.c.bf16 %v762_v5, %v761_v1 }
 0x4d9   :  { %1583 = vmatprep.subr.bf16.mxu1 %v1791_v0 }
 0x4da   :  { %1602 = vmatprep.subr.bf16.mxu0 %v1601_v7 }
 0x4dc   :  { %1585 = vmatpush3.bf16.msra.mxu1 %v1924_v10  ;;  %v581_v10 = vmul.f32 0.9, %v505_v12 }
 0x4dd   :  { %1586 = vmatprep.subr.bf16.mxu1 %v1791_v0 }
 0x4e0   :  { %1588 = vmatpush3.bf16.msra.mxu1 %v1930_v13 }
 0x4e1   :  { %1589 = vmatprep.subr.bf16.mxu1 %v1791_v0 }
 0x4e4   :  { %1591 = vmatpush3.bf16.msra.mxu1 %v1936_v16 }
 0x4e5   :  { %1592 = vmatprep.subr.bf16.mxu1 %v1791_v0 }
 0x4e8   :  { %1594 = vmatpush3.bf16.msra.mxu1 %v1942_v19  ;;  %v763_v19 = vld [vmem:[#allocation10 + $0x10] sm:$0xff] }
 0x4e9   :  { %1595 = vmatprep.subr.bf16.mxu1 %v1791_v0 }
 0x4ec   :  { %1597 = vmatpush3.bf16.msra.mxu1 %v1948_v24  ;;  %v1605_v24 = vpack.c.bf16 %v764_v23, %v763_v19 }
 0x4ed   :  { %1598 = vmatprep.subr.bf16.mxu1 %v1791_v0  ;;  %v766_v0 = vld [vmem:[#allocation10 + $0x28] sm:$0xff] }
 0x4f0   :  { %1600 = vmatpush3.bf16.msra.mxu1 %v1954_v28  ;;  %v1609_v28 = vpack.c.bf16 %v766_v0, %v765_v27 }
 0x5a6   :  { %v577_v13 = vpop.f32.mrb[6].mxu1 }
 0x5a7   :  { %v582_v16 = vadd.f32 %v581_v10, %v577_v13  ;;  %v1294_v20 = vpop.f32.mrb[7].mxu1 }
 0x5a9   :  { %v585_v21 = vadd.f32 %v584_v18, %v582_v16 }
 0x5ab   :  { %v586_v22 = vmax.f32 %v585_v21, 0.0  ;;  %v661_v44 = vmul.f32 0.9, %v585_v21 }
 0x5ad   :  { %v587_v25 = vmul.f32 0.3, %v586_v22 }
 0x5af   :  { %v588_v26 = vmul.f32 %v587_v25, %v586_v22 }
 0x5b1   :  { %1328 = vmatmul.mubr.f32.vlgmr.msra.gmra.mrb[4].mxu0 %v588_v26 }
 0x5b2   :  { %1604 = vmatpush3.bf16.msra.mxu0 %v1601_v7  ;;  %1397 = vmatprep.mubr.f32.mxu0 %v1981_v38  ;;  %v1625_v38 = vpack.c.bf16 %v774_v40, %v773_v39 }
 0x5b3   :  { %1606 = vmatprep.subr.bf16.mxu0 %v1605_v24 }
 0x5b6   :  { %1608 = vmatpush3.bf16.msra.mxu0 %v1605_v24 }
 0x5b7   :  { %1610 = vmatprep.subr.bf16.mxu0 %v1609_v28 }
 0x5ba   :  { %1612 = vmatpush3.bf16.msra.mxu0 %v1609_v28 }
 0x5bb   :  { %1614 = vmatprep.subr.bf16.mxu0 %v1613_v31 }
 0x5be   :  { %1616 = vmatpush3.bf16.msra.mxu0 %v1613_v31 }
 0x5bf   :  { %1618 = vmatprep.subr.bf16.mxu0 %v1617_v34 }
 0x5c2   :  { %1620 = vmatpush3.bf16.msra.mxu0 %v1617_v34 }
 0x5c3   :  { %1622 = vmatprep.subr.bf16.mxu0 %v1621_v37 }
 0x5c6   :  { %1624 = vmatpush3.bf16.msra.mxu0 %v1621_v37 }
 0x5c7   :  { %1626 = vmatprep.subr.bf16.mxu0 %v1625_v38 }
 0x5ca   :  { %1628 = vmatpush3.bf16.msra.mxu0 %v1625_v38 }
 0x5cb   :  { %1630 = vmatprep.subr.bf16.mxu0 %v1629_v43 }
 0x5ce   :  { %1632 = vmatpush3.bf16.msra.mxu0 %v1629_v43 }
 0x5d1   :  { %1398 = vmatmul.mubr.f32.vlgmr.msra.gmra.mrb[6].mxu0 %v2002_v47 }
 0x5d2   :  { %1400 = vmatprep.mubr.f32.mxu0 %v2023_v56 }
 0x5d5   :  { %1401 = vmatmul.mubr.f32.gmra.mrb[8].mxu0 %v2044_v3 }
 0x5d6   :  { %1403 = vmatprep.mubr.f32.mxu0 %v2064_v17 }
 0x5d9   :  { %1404 = vmatmul.mubr.f32.gmra.mrb[10].mxu0 %v588_v26 }
 0x684   :  { %v657_v45 = vpop.f32.mrb[4].mxu0 }
 0x685   :  { %v662_v48 = vadd.f32 %v661_v44, %v657_v45  ;;  %v1329_v49 = vpop.f32.mrb[5].mxu0 }
 0x687   :  { %v665_v50 = vadd.f32 %v664_v46, %v662_v48 }
 0x689   :  { %v666_v51 = vmax.f32 %v665_v50, 0.0  ;;  %v741_v4 = vmul.f32 0.9, %v665_v50 }
 0x68b   :  { %v667_v52 = vmul.f32 0.3, %v666_v51 }
 0x68d   :  { %v668_v53 = vmul.f32 %v667_v52, %v666_v51 }
 0x68f   :  { %1363 = vmatmul.mubr.f32.vlgmr.msra.gmra.mrb[8].mxu1 %v668_v53  ;;  %1406 = vmatprep.mubr.f32.mxu0 %v668_v53 }
 0x6a4   :  { %v1399_v47 = vpop.f32.mrb[6].mxu0 }
 0x6a5   :  { %v890_v55 = vadd.f32 %v1399_v47, %v924_v54  ;;  %v843_v56 = vpop.f32.mrb[7].mxu0 }
 0x6a6   :  { %v889_v57 = vadd.f32 %v924_v54, %v843_v56 }
 0x6a7   :  { %898 = vst [vmem:[#allocation14 + $0x8] sm:$0xff] %v890_v55 }
 0x6a8   :  { %897 = vst [vmem:[#allocation14] sm:$0xff] %v889_v57  ;;  %v1402_v58 = vpop.f32.mrb[8].mxu0 }
 0x6a9   :  { %v892_v59 = vadd.f32 %v1402_v58, %v924_v54  ;;  %v853_v60 = vpop.f32.mrb[9].mxu0 }
 0x6aa   :  { %v891_v61 = vadd.f32 %v924_v54, %v853_v60 }
 0x6ab   :  { %900 = vst [vmem:[#allocation14 + $0x18] sm:$0xff] %v892_v59 }
 0x6ac   :  { %899 = vst [vmem:[#allocation14 + $0x10] sm:$0xff] %v891_v61  ;;  %v1405_v62 = vpop.f32.mrb[10].mxu0 }
 0x6ad   :  { %v894_v63 = vadd.f32 %v1405_v62, %v924_v54  ;;  %v863_v2 = vpop.f32.mrb[11].mxu0 }
 0x6ae   :  { %v893_v3 = vadd.f32 %v924_v54, %v863_v2 }
 0x6af   :  { %902 = vst [vmem:[#allocation14 + $0x28] sm:$0xff] %v894_v63 }
 0x6b0   :  { %901 = vst [vmem:[#allocation14 + $0x20] sm:$0xff] %v893_v3 }
 0x762   :  { %v737_v6 = vpop.f32.mrb[8].mxu1 }
 0x763   :  { %v742_v9 = vadd.f32 %v741_v4, %v737_v6  ;;  %v1364_v11 = vpop.f32.mrb[9].mxu1 }
 0x765   :  { %v745_v12 = vadd.f32 %v744_v8, %v742_v9 }
 0x767   :  { %v746_v14 = vmax.f32 %v745_v12, 0.0 }
 0x769   :  { %v747_v15 = vmul.f32 0.3, %v746_v14 }
 0x76b   :  { %v748_v17 = vmul.f32 %v747_v15, %v746_v14 }
 0x76d   :  { %1407 = vmatmul.mubr.f32.gmra.mrb[12].mxu0 %v748_v17 }
 0x840   :  { %v1408_v1 = vpop.f32.mrb[12].mxu0 }
 0x841   :  { %v896_v5 = vadd.f32 %v1408_v1, %v924_v54  ;;  %v873_v7 = vpop.f32.mrb[13].mxu0 }
 0x842   :  { %v895_v10 = vadd.f32 %v924_v54, %v873_v7 }
 0x843   :  { %904 = vst [vmem:[#allocation14 + $0x38] sm:$0xff] %v896_v5 }
 0x844   :  { %903 = vst [vmem:[#allocation14 + $0x30] sm:$0xff] %v895_v10 }
 0x845   :  { %1765 = shalt.err (!%p1762_p2)
}
 0x846   :  { %s1766_s8 = scalar_lea.hbm %s2109_s5, 1024 }
 0x847   :  { %p1767_p3 = scmp.ne.s32.totalorder %s2109_s5, %s1766_s8  ;;  %p1770_p4 = scmp.lt.u32.totalorder %s1766_s8, %s2109_s5 }
 0x849   :  { %p1772_p5 = pnand %p1770_p4, %p1767_p3 }
 0x84b   :  { %1775 = shalt.err (!%p1772_p5)
}
 0x84c   :  { %916 = dma.vmem_to_hbm [thread:$0]  %s911_s29, 1024, %s2109_s5, [#allocation7], %s1786_s30, %s1786_s30, %s1787_s6  }
 0x84d   :  { %1782 = dma.done.wait [#allocation7], 1024  }
 0x84e   :  { %1783 = vsyncadd [#allocation7], 4294966272 }
 0x84f   :  { %920 = vsyncpa [#allocation6], 1 }
 0x850   :  { %921 = vsyncpa [#allocation9], 1 }
 0x851   :  { %922 = vsyncpa [#allocation12], 1 }
 0x852   :  { %923 = vsyncpa [#allocation7], 1 }

// kernel: tpu_custom_call.1
= control target key start
LH: loop header
LB: loop body
LE: loop exit
PB: predicated region body
PF: predicated region fallthrough
CT: control target
= control target key end

     0   :  { %10 = vsyncpa [#allocation6], 0  ;;  %s2104_s0 = inlined_call_operand.hbm [shape: f32[8,8,128], index: 0, kind: input, shape index: {}]   ;;  %s2105_s1 = inlined_call_operand.hbm [shape: f32[128,128], index: 1, kind: input, shape index: {}]   ;;  %s2106_s2 = inlined_call_operand.hbm [shape: f32[128,128], index: 2, kind: input, shape index: {}]   ;;  %s2107_s3 = inlined_call_operand.hbm [shape: f32[1,128], index: 3, kind: input, shape index: {}]   ;;  %s2108_s4 = inlined_call_operand.hbm [shape: f32[8,128], index: 4, kind: input, shape index: {}]   ;;  %s2109_s5 = inlined_call_operand.hbm [shape: f32[8,8,128], index: 5, kind: output, shape index: {}]  }
   0x1   :  { %11 = vsyncpa [#allocation9], 0 }
   0x2   :  { %12 = vsyncpa [#allocation12], 0 }
   0x3   :  { %13 = vsyncpa [#allocation7], 0  ;;  %s1784_s18 = smov [#allocation8]   ;;  %s1785_s20 = smov [#allocation11]  }
   0x4   :  { %s31_s19 = sshll.u32 %s1784_s18, 4  ;;  %s56_s21 = sshll.u32 %s1785_s20, 4  ;;  %s32_s19 = int_to_ptr.vmem [resolvable:$true] %s31_s19  ;;  %s1825_s21 = int_to_ptr.vmem [resolvable:$true] %s56_s21 }
   0x5   :  { %s1644_s24 = scalar_lea.hbm %s2105_s1, 2048 }
   0x6   :  { %p1645_p0 = scmp.ne.s32.totalorder %s2105_s1, %s1644_s24  ;;  %p1648_p1 = scmp.lt.u32.totalorder %s1644_s24, %s2105_s1 }
   0x8   :  { %p1650_p2 = pnand %p1648_p1, %p1645_p0 }
   0xa   :  { %1653 = shalt.err (!%p1650_p2)
}
   0xb   :  { %s1654_s29 = scalar_lea.vmem %s32_s19, 2048  ;;  %p1659_p4 = scmp.lt.s32.totalorder %s32_s19, %s32_s19 }
   0xc   :  { %p1655_p3 = scmp.ne.s32.totalorder %s32_s19, %s1654_s29  ;;  %p1660_p5 = scmp.lt.s32.totalorder %s1654_s29, %s1654_s29 }
   0xe   :  { %p1661_p6 = por %p1660_p5, %p1659_p4 }
  0x10   :  { %p1662_p7 = pnand %p1661_p6, %p1655_p3 }
  0x12   :  { %1665 = shalt.err (!%p1662_p7)
}
  0x13   :  { %s1786_s30 = smov 128   ;;  %s1787_s6 = smov 8  }
  0x14   :  { %37 = dma.hbm_to_vmem [thread:$0]  %s2105_s1, 2048, %s32_s19, [#allocation9], %s1786_s30, %s1786_s30, %s1787_s6  }
  0x15   :  { %s1666_s11 = scalar_lea.hbm %s2107_s3, 16 }
  0x16   :  { %p1667_p8 = scmp.ne.s32.totalorder %s2107_s3, %s1666_s11  ;;  %p1670_p9 = scmp.lt.u32.totalorder %s1666_s11, %s2107_s3 }
  0x18   :  { %p1672_p10 = pnand %p1670_p9, %p1667_p8 }
  0x1a   :  { %1675 = shalt.err (!%p1672_p10)
}
  0x1b   :  { %s1676_s16 = scalar_lea.vmem %s1825_s21, 16  ;;  %s1680_s1 = scalar_lea.vmem %s1825_s21, 32 }
  0x1c   :  { %p1677_p11 = scmp.ne.s32.totalorder %s1825_s21, %s1676_s16  ;;  %p1681_p12 = scmp.lt.s32.totalorder %s1825_s21, %s1825_s21 }
  0x1d   :  { %p1682_p13 = scmp.lt.s32.totalorder %s1680_s1, %s1676_s16 }
  0x1f   :  { %p1683_p0 = por %p1682_p13, %p1681_p12 }
  0x21   :  { %p1684_p1 = pnand %p1683_p0, %p1677_p11 }
  0x23   :  { %1687 = shalt.err (!%p1684_p1)
}
  0x24   :  { %59 = dma.hbm_to_vmem [thread:$0]  %s2107_s3, 16, %s1825_s21, [#allocation12]  }
  0x25   :  { %s1788_s19 = smov [#allocation5]   ;;  %s1789_s22 = smov [#allocation10]  }
  0x26   :  { %s19_s20 = sshll.u32 %s1788_s19, 4  ;;  %s43_s23 = sshll.u32 %s1789_s22, 4  ;;  %s20_s20 = int_to_ptr.vmem [resolvable:$true] %s19_s20  ;;  %s1860_s23 = int_to_ptr.vmem [resolvable:$true] %s43_s23 }
  0x27   :  { %s1688_s26 = scalar_lea.hbm %s2104_s0, 1024 }
  0x28   :  { %p1689_p2 = scmp.ne.s32.totalorder %s2104_s0, %s1688_s26  ;;  %p1692_p3 = scmp.lt.u32.totalorder %s1688_s26, %s2104_s0 }
  0x2a   :  { %p1694_p4 = pnand %p1692_p3, %p1689_p2 }
  0x2c   :  { %1697 = shalt.err (!%p1694_p4)
}
  0x2d   :  { %s1698_s3 = scalar_lea.vmem %s20_s20, 1024  ;;  %p1703_p6 = scmp.lt.s32.totalorder %s20_s20, %s20_s20 }
  0x2e   :  { %p1699_p5 = scmp.ne.s32.totalorder %s20_s20, %s1698_s3  ;;  %p1704_p7 = scmp.lt.s32.totalorder %s1698_s3, %s1698_s3 }
  0x30   :  { %p1705_p8 = por %p1704_p7, %p1703_p6 }
  0x32   :  { %p1706_p9 = pnand %p1705_p8, %p1699_p5 }
  0x34   :  { %1709 = shalt.err (!%p1706_p9)
}
  0x35   :  { %25 = dma.hbm_to_vmem [thread:$0]  %s2104_s0, 1024, %s20_s20, [#allocation6], %s1786_s30, %s1786_s30, %s1787_s6  }
  0x36   :  { %s1710_s11 = scalar_lea.hbm %s2106_s2, 2048 }
  0x37   :  { %p1711_p10 = scmp.ne.s32.totalorder %s2106_s2, %s1710_s11  ;;  %p1714_p11 = scmp.lt.u32.totalorder %s1710_s11, %s2106_s2 }
  0x39   :  { %p1716_p12 = pnand %p1714_p11, %p1711_p10 }
  0x3b   :  { %1719 = shalt.err (!%p1716_p12)
}
  0x3c   :  { %s1720_s16 = scalar_lea.vmem %s1860_s23, 2048  ;;  %p1725_p0 = scmp.lt.s32.totalorder %s1860_s23, %s1860_s23 }
  0x3d   :  { %p1721_p13 = scmp.ne.s32.totalorder %s1860_s23, %s1720_s16  ;;  %p1726_p1 = scmp.lt.s32.totalorder %s1720_s16, %s1720_s16 }
  0x3f   :  { %p1727_p2 = por %p1726_p1, %p1725_p0 }
  0x41   :  { %p1728_p3 = pnand %p1727_p2, %p1721_p13 }
  0x43   :  { %1731 = shalt.err (!%p1728_p3)
}
  0x44   :  { %49 = dma.hbm_to_vmem [thread:$0]  %s2106_s2, 2048, %s1860_s23, [#allocation9], %s1786_s30, %s1786_s30, %s1787_s6  }
  0x45   :  { %s1790_s17 = smov [#allocation13]   ;;  %s1732_s22 = scalar_lea.hbm %s2108_s4, 128 }
  0x46   :  { %s66_s18 = sshll.u32 %s1790_s17, 4  ;;  %p1733_p4 = scmp.ne.s32.totalorder %s2108_s4, %s1732_s22  ;;  %s67_s18 = int_to_ptr.vmem [resolvable:$true] %s66_s18 }
  0x47   :  { %p1736_p5 = scmp.lt.u32.totalorder %s1732_s22, %s2108_s4 }
  0x49   :  { %p1738_p6 = pnand %p1736_p5, %p1733_p4 }
  0x4b   :  { %1741 = shalt.err (!%p1738_p6)
}
  0x4c   :  { %s1742_s28 = scalar_lea.vmem %s67_s18, 128  ;;  %p1747_p8 = scmp.lt.s32.totalorder %s67_s18, %s67_s18 }
  0x4d   :  { %p1743_p7 = scmp.ne.s32.totalorder %s67_s18, %s1742_s28  ;;  %p1748_p9 = scmp.lt.s32.totalorder %s1742_s28, %s1742_s28 }
  0x4f   :  { %p1749_p10 = por %p1748_p9, %p1747_p8 }
  0x51   :  { %p1750_p11 = pnand %p1749_p10, %p1743_p7 }
  0x53   :  { %1753 = shalt.err (!%p1750_p11)
}
  0x54   :  { %69 = dma.hbm_to_vmem [thread:$0]  %s2108_s4, 128, %s67_s18, [#allocation12]  }
  0x55   :  { %1776 = dma.done.wait [#allocation6], 1024  }
  0x56   :  { %1777 = vsyncadd [#allocation6], 4294966272 }
  0x57   :  { %1778 = dma.done.wait [#allocation9], 4096  }
  0x58   :  { %1779 = vsyncadd [#allocation9], 4294963200 }
  0x59   :  { %1780 = dma.done.wait [#allocation12], 144  }
  0x5a   :  { %1781 = vsyncadd [#allocation12], 4294967152  ;;  %v1791_v0 = vmov 0.0|0.0   ;;  %vm1792_vm0 = vmmov 0   ;;  %v1793_v1 = vmov 0.0   ;;  %v95_v2 = vld [vmem:[#allocation8] sm:$0xff] }
  0x5b   :  { %1409 = vmatprep.subr.bf16.mxu1 %v1791_v0  ;;  %1117 = vmatprep.mubr.msk.f32.mxu1 %vm1792_vm0, %v1793_v1  ;;  %v96_v3 = vld [vmem:[#allocation8 + $0x8] sm:$0xff]  ;;  %v97_v4 = vld [vmem:[#allocation8 + $0x10] sm:$0xff]  ;;  %v98_v6 = vld [vmem:[#allocation8 + $0x18] sm:$0xff]  ;;  %s1794_s4 = smov [#allocation14]  }
  0x5c   :  { %1457 = vmatprep.subr.bf16.mxu0 %v1791_v0  ;;  %1187 = vmatprep.mubr.msk.f32.mxu0 %vm1792_vm0, %v1793_v1  ;;  %v1915_v5 = vpack.c.bf16 %v96_v3, %v95_v2  ;;  %v1918_v7 = vpack.c.bf16 %v98_v6, %v97_v4  ;;  %v99_v8 = vld [vmem:[#allocation8 + $0x20] sm:$0xff]  ;;  %v100_v9 = vld [vmem:[#allocation8 + $0x28] sm:$0xff]  ;;  %v101_v11 = vld [vmem:[#allocation8 + $0x30] sm:$0xff]  ;;  %s910_s29 = sshll.u32 %s1794_s4, 4  ;;  %s911_s29 = int_to_ptr.vmem [resolvable:$true] %s910_s29 }
  0x5d   :  { %v1924_v10 = vpack.c.bf16 %v100_v9, %v99_v8  ;;  %v102_v12 = vld [vmem:[#allocation8 + $0x38] sm:$0xff]  ;;  %v103_v14 = vld [vmem:[#allocation8 + $0x40] sm:$0xff]  ;;  %v104_v15 = vld [vmem:[#allocation8 + $0x48] sm:$0xff]  ;;  %s1754_s7 = scalar_lea.vmem %s911_s29, 1024  ;;  %p1759_p13 = scmp.lt.s32.totalorder %s911_s29, %s911_s29 }
  0x5e   :  { %1411 = vmatpush3.bf16.msra.mxu1 %v1915_v5  ;;  %1459 = vmatpush3.bf16.msra.mxu0 %v1915_v5  ;;  %v1930_v13 = vpack.c.bf16 %v102_v12, %v101_v11  ;;  %v1936_v16 = vpack.c.bf16 %v104_v15, %v103_v14  ;;  %v105_v17 = vld [vmem:[#allocation8 + $0x50] sm:$0xff]  ;;  %v106_v18 = vld [vmem:[#allocation8 + $0x58] sm:$0xff]  ;;  %v89_v20 = vld [vmem:[#allocation13] sm:$0xff]  ;;  %p1755_p12 = scmp.ne.s32.totalorder %s911_s29, %s1754_s7  ;;  %p1760_p0 = scmp.lt.s32.totalorder %s1754_s7, %s1754_s7 }
  0x5f   :  { %1412 = vmatprep.subr.bf16.mxu1 %v1791_v0  ;;  %1460 = vmatprep.subr.bf16.mxu0 %v1791_v0  ;;  %v1942_v19 = vpack.c.bf16 %v106_v18, %v105_v17  ;;  %v107_v21 = vld [vmem:[#allocation8 + $0x60] sm:$0xff]  ;;  %v108_v22 = vld [vmem:[#allocation8 + $0x68] sm:$0xff]  ;;  %v91_v23 = vmax.f32 %v89_v20, 0.0  ;;  %v109_v25 = vld [vmem:[#allocation8 + $0x70] sm:$0xff]  ;;  %v183_v30 = vmul.f32 0.9, %v89_v20 }
  0x60   :  { %v1948_v24 = vpack.c.bf16 %v108_v22, %v107_v21  ;;  %v110_v26 = vld [vmem:[#allocation8 + $0x78] sm:$0xff]  ;;  %v185_v32 = vld [vmem:[#allocation5] sm:$0xff]  ;;  %v264_v41 = vld [vmem:[#allocation5 + $0x8] sm:$0xff]  ;;  %p1761_p1 = por %p1760_p0, %p1759_p13 }
  0x61   :  { %v92_v27 = vmul.f32 0.3, %v91_v23  ;;  %v1954_v28 = vpack.c.bf16 %v110_v26, %v109_v25  ;;  %v344_v50 = vld [vmem:[#allocation5 + $0x10] sm:$0xff]  ;;  %v424_v59 = vld [vmem:[#allocation5 + $0x18] sm:$0xff]  ;;  %v504_v8 = vld [vmem:[#allocation5 + $0x20] sm:$0xff] }
  0x62   :  { %1414 = vmatpush3.bf16.msra.mxu1 %v1918_v7  ;;  %1462 = vmatpush3.bf16.msra.mxu0 %v1918_v7  ;;  %v584_v18 = vld [vmem:[#allocation5 + $0x28] sm:$0xff]  ;;  %p1762_p2 = pnand %p1761_p1, %p1755_p12 }
  0x63   :  { %1415 = vmatprep.subr.bf16.mxu1 %v1791_v0  ;;  %1463 = vmatprep.subr.bf16.mxu0 %v1791_v0  ;;  %v93_v29 = vmul.f32 %v92_v27, %v91_v23  ;;  %v764_v23 = vld [vmem:[#allocation10 + $0x18] sm:$0xff]  ;;  %v765_v27 = vld [vmem:[#allocation10 + $0x20] sm:$0xff] }
  0x66   :  { %1417 = vmatpush3.bf16.msra.mxu1 %v1924_v10  ;;  %1465 = vmatpush3.bf16.msra.mxu0 %v1924_v10 }
  0x67   :  { %1418 = vmatprep.subr.bf16.mxu1 %v1791_v0  ;;  %1466 = vmatprep.subr.bf16.mxu0 %v1791_v0 }
  0x6a   :  { %1420 = vmatpush3.bf16.msra.mxu1 %v1930_v13  ;;  %1468 = vmatpush3.bf16.msra.mxu0 %v1930_v13 }
  0x6b   :  { %1421 = vmatprep.subr.bf16.mxu1 %v1791_v0  ;;  %1469 = vmatprep.subr.bf16.mxu0 %v1791_v0 }
  0x6e   :  { %1423 = vmatpush3.bf16.msra.mxu1 %v1936_v16  ;;  %1471 = vmatpush3.bf16.msra.mxu0 %v1936_v16 }
  0x6f   :  { %1424 = vmatprep.subr.bf16.mxu1 %v1791_v0  ;;  %1472 = vmatprep.subr.bf16.mxu0 %v1791_v0 }
  0x72   :  { %1426 = vmatpush3.bf16.msra.mxu1 %v1942_v19  ;;  %1474 = vmatpush3.bf16.msra.mxu0 %v1942_v19 }
  0x73   :  { %1427 = vmatprep.subr.bf16.mxu1 %v1791_v0  ;;  %1475 = vmatprep.subr.bf16.mxu0 %v1791_v0 }
  0x76   :  { %1429 = vmatpush3.bf16.msra.mxu1 %v1948_v24  ;;  %1477 = vmatpush3.bf16.msra.mxu0 %v1948_v24 }
  0x77   :  { %1430 = vmatprep.subr.bf16.mxu1 %v1791_v0  ;;  %1478 = vmatprep.subr.bf16.mxu0 %v1791_v0 }
  0x7a   :  { %1432 = vmatpush3.bf16.msra.mxu1 %v1954_v28  ;;  %1480 = vmatpush3.bf16.msra.mxu0 %v1954_v28 }
  0x7b   :  { %1433 = vmatprep.subr.bf16.mxu1 %v1791_v0  ;;  %1505 = vmatprep.subr.bf16.mxu0 %v1791_v0 }
  0x7d   :  { %1118 = vmatmul.mubr.f32.vlgmr.msra.gmra.mrb[0].mxu1 %v93_v29  ;;  %v767_v29 = vld [vmem:[#allocation10 + $0x30] sm:$0xff] }
  0x7e   :  { %1435 = vmatpush3.bf16.msra.mxu1 %v1915_v5  ;;  %1152 = vmatprep.mubr.msk.f32.mxu1 %vm1792_vm0, %v1793_v1 }
  0x7f   :  { %1436 = vmatprep.subr.bf16.mxu1 %v1791_v0 }
  0x82   :  { %1438 = vmatpush3.bf16.msra.mxu1 %v1918_v7 }
  0x83   :  { %1439 = vmatprep.subr.bf16.mxu1 %v1791_v0 }
  0x86   :  { %1441 = vmatpush3.bf16.msra.mxu1 %v1924_v10 }
  0x87   :  { %1442 = vmatprep.subr.bf16.mxu1 %v1791_v0 }
  0x8a   :  { %1444 = vmatpush3.bf16.msra.mxu1 %v1930_v13 }
  0x8b   :  { %1445 = vmatprep.subr.bf16.mxu1 %v1791_v0 }
  0x8e   :  { %1447 = vmatpush3.bf16.msra.mxu1 %v1936_v16 }
  0x8f   :  { %1448 = vmatprep.subr.bf16.mxu1 %v1791_v0 }
  0x92   :  { %1450 = vmatpush3.bf16.msra.mxu1 %v1942_v19 }
  0x93   :  { %1451 = vmatprep.subr.bf16.mxu1 %v1791_v0 }
  0x96   :  { %1453 = vmatpush3.bf16.msra.mxu1 %v1948_v24 }
  0x97   :  { %1454 = vmatprep.subr.bf16.mxu1 %v1791_v0 }
  0x9a   :  { %1456 = vmatpush3.bf16.msra.mxu1 %v1954_v28 }
  0x9b   :  { %1481 = vmatprep.subr.bf16.mxu1 %v1791_v0 }
 0x150   :  { %v179_v31 = vpop.f32.mrb[0].mxu1 }
 0x151   :  { %v184_v33 = vadd.f32 %v183_v30, %v179_v31  ;;  %v1119_v34 = vpop.f32.mrb[1].mxu1  ;;  %v768_v30 = vld [vmem:[#allocation10 + $0x38] sm:$0xff] }
 0x152   :  { %v1613_v31 = vpack.c.bf16 %v768_v30, %v767_v29 }
 0x153   :  { %v186_v35 = vadd.f32 %v185_v32, %v184_v33  ;;  %v769_v32 = vld [vmem:[#allocation10 + $0x40] sm:$0xff]  ;;  %v770_v33 = vld [vmem:[#allocation10 + $0x48] sm:$0xff] }
 0x154   :  { %v1617_v34 = vpack.c.bf16 %v770_v33, %v769_v32 }
 0x155   :  { %v187_v36 = vmax.f32 %v186_v35, 0.0  ;;  %v261_v39 = vmul.f32 0.9, %v186_v35  ;;  %v771_v35 = vld [vmem:[#allocation10 + $0x50] sm:$0xff] }
 0x157   :  { %v188_v37 = vmul.f32 0.3, %v187_v36 }
 0x159   :  { %v1981_v38 = vmul.f32 %v188_v37, %v187_v36  ;;  %v772_v36 = vld [vmem:[#allocation10 + $0x58] sm:$0xff] }
 0x15a   :  { %v1621_v37 = vpack.c.bf16 %v772_v36, %v771_v35 }
 0x15b   :  { %1153 = vmatmul.mubr.f32.vlgmr.msra.gmra.mrb[2].mxu1 %v1981_v38 }
 0x15c   :  { %1483 = vmatpush3.bf16.msra.mxu1 %v1915_v5  ;;  %1222 = vmatprep.mubr.msk.f32.mxu1 %vm1792_vm0, %v1793_v1 }
 0x15d   :  { %1484 = vmatprep.subr.bf16.mxu1 %v1791_v0 }
 0x160   :  { %1486 = vmatpush3.bf16.msra.mxu1 %v1918_v7 }
 0x161   :  { %1487 = vmatprep.subr.bf16.mxu1 %v1791_v0 }
 0x164   :  { %1489 = vmatpush3.bf16.msra.mxu1 %v1924_v10 }
 0x165   :  { %1490 = vmatprep.subr.bf16.mxu1 %v1791_v0 }
 0x168   :  { %1492 = vmatpush3.bf16.msra.mxu1 %v1930_v13 }
 0x169   :  { %1493 = vmatprep.subr.bf16.mxu1 %v1791_v0 }
 0x16c   :  { %1495 = vmatpush3.bf16.msra.mxu1 %v1936_v16 }
 0x16d   :  { %1496 = vmatprep.subr.bf16.mxu1 %v1791_v0 }
 0x170   :  { %1498 = vmatpush3.bf16.msra.mxu1 %v1942_v19 }
 0x171   :  { %1499 = vmatprep.subr.bf16.mxu1 %v1791_v0 }
 0x174   :  { %1501 = vmatpush3.bf16.msra.mxu1 %v1948_v24 }
 0x175   :  { %1502 = vmatprep.subr.bf16.mxu1 %v1791_v0 }
 0x178   :  { %1504 = vmatpush3.bf16.msra.mxu1 %v1954_v28 }
 0x179   :  { %1529 = vmatprep.subr.bf16.mxu1 %v1791_v0 }
 0x22e   :  { %v257_v40 = vpop.f32.mrb[2].mxu1 }
 0x22f   :  { %v262_v42 = vadd.f32 %v261_v39, %v257_v40  ;;  %v1154_v43 = vpop.f32.mrb[3].mxu1  ;;  %v773_v39 = vld [vmem:[#allocation10 + $0x60] sm:$0xff]  ;;  %v774_v40 = vld [vmem:[#allocation10 + $0x68] sm:$0xff] }
 0x231   :  { %v265_v44 = vadd.f32 %v264_v41, %v262_v42  ;;  %v775_v41 = vld [vmem:[#allocation10 + $0x70] sm:$0xff]  ;;  %v776_v42 = vld [vmem:[#allocation10 + $0x78] sm:$0xff] }
 0x232   :  { %v1629_v43 = vpack.c.bf16 %v776_v42, %v775_v41 }
 0x233   :  { %v266_v45 = vmax.f32 %v265_v44, 0.0  ;;  %v341_v48 = vmul.f32 0.9, %v265_v44 }
 0x235   :  { %v267_v46 = vmul.f32 0.3, %v266_v45 }
 0x237   :  { %v2002_v47 = vmul.f32 %v267_v46, %v266_v45  ;;  %v664_v46 = vld [vmem:[#allocation5 + $0x30] sm:$0xff] }
 0x239   :  { %1188 = vmatmul.mubr.f32.vlgmr.msra.gmra.mrb[0].mxu0 %v2002_v47 }
 0x23a   :  { %1507 = vmatpush3.bf16.msra.mxu0 %v1915_v5  ;;  %1257 = vmatprep.mubr.msk.f32.mxu0 %vm1792_vm0, %v1793_v1 }
 0x23b   :  { %1508 = vmatprep.subr.bf16.mxu0 %v1791_v0 }
 0x23e   :  { %1510 = vmatpush3.bf16.msra.mxu0 %v1918_v7 }
 0x23f   :  { %1511 = vmatprep.subr.bf16.mxu0 %v1791_v0 }
 0x242   :  { %1513 = vmatpush3.bf16.msra.mxu0 %v1924_v10 }
 0x243   :  { %1514 = vmatprep.subr.bf16.mxu0 %v1791_v0 }
 0x246   :  { %1516 = vmatpush3.bf16.msra.mxu0 %v1930_v13 }
 0x247   :  { %1517 = vmatprep.subr.bf16.mxu0 %v1791_v0 }
 0x24a   :  { %1519 = vmatpush3.bf16.msra.mxu0 %v1936_v16 }
 0x24b   :  { %1520 = vmatprep.subr.bf16.mxu0 %v1791_v0 }
 0x24e   :  { %1522 = vmatpush3.bf16.msra.mxu0 %v1942_v19 }
 0x24f   :  { %1523 = vmatprep.subr.bf16.mxu0 %v1791_v0 }
 0x252   :  { %1525 = vmatpush3.bf16.msra.mxu0 %v1948_v24 }
 0x253   :  { %1526 = vmatprep.subr.bf16.mxu0 %v1791_v0 }
 0x256   :  { %1528 = vmatpush3.bf16.msra.mxu0 %v1954_v28 }
 0x257   :  { %1553 = vmatprep.subr.bf16.mxu0 %v1791_v0 }
 0x30c   :  { %v337_v49 = vpop.f32.mrb[0].mxu0 }
 0x30d   :  { %v342_v51 = vadd.f32 %v341_v48, %v337_v49  ;;  %v1189_v52 = vpop.f32.mrb[1].mxu0 }
 0x30f   :  { %v345_v53 = vadd.f32 %v344_v50, %v342_v51 }
 0x311   :  { %v346_v54 = vmax.f32 %v345_v53, 0.0  ;;  %v421_v57 = vmul.f32 0.9, %v345_v53 }
 0x313   :  { %v347_v55 = vmul.f32 0.3, %v346_v54 }
 0x315   :  { %v2023_v56 = vmul.f32 %v347_v55, %v346_v54  ;;  %v924_v54 = vld [vmem:[#allocation11] ss:$0 sm:$0xff] }
 0x317   :  { %1223 = vmatmul.mubr.f32.vlgmr.msra.gmra.mrb[4].mxu1 %v2023_v56 }
 0x318   :  { %1531 = vmatpush3.bf16.msra.mxu1 %v1915_v5  ;;  %1292 = vmatprep.mubr.msk.f32.mxu1 %vm1792_vm0, %v1793_v1 }
 0x319   :  { %1532 = vmatprep.subr.bf16.mxu1 %v1791_v0 }
 0x31c   :  { %1534 = vmatpush3.bf16.msra.mxu1 %v1918_v7 }
 0x31d   :  { %1535 = vmatprep.subr.bf16.mxu1 %v1791_v0 }
 0x320   :  { %1537 = vmatpush3.bf16.msra.mxu1 %v1924_v10 }
 0x321   :  { %1538 = vmatprep.subr.bf16.mxu1 %v1791_v0 }
 0x324   :  { %1540 = vmatpush3.bf16.msra.mxu1 %v1930_v13 }
 0x325   :  { %1541 = vmatprep.subr.bf16.mxu1 %v1791_v0 }
 0x328   :  { %1543 = vmatpush3.bf16.msra.mxu1 %v1936_v16 }
 0x329   :  { %1544 = vmatprep.subr.bf16.mxu1 %v1791_v0 }
 0x32c   :  { %1546 = vmatpush3.bf16.msra.mxu1 %v1942_v19 }
 0x32d   :  { %1547 = vmatprep.subr.bf16.mxu1 %v1791_v0 }
 0x330   :  { %1549 = vmatpush3.bf16.msra.mxu1 %v1948_v24 }
 0x331   :  { %1550 = vmatprep.subr.bf16.mxu1 %v1791_v0 }
 0x334   :  { %1552 = vmatpush3.bf16.msra.mxu1 %v1954_v28 }
 0x335   :  { %1577 = vmatprep.subr.bf16.mxu1 %v1791_v0 }
 0x3ea   :  { %v417_v58 = vpop.f32.mrb[4].mxu1 }
 0x3eb   :  { %v422_v60 = vadd.f32 %v421_v57, %v417_v58  ;;  %v1224_v61 = vpop.f32.mrb[5].mxu1 }
 0x3ed   :  { %v425_v62 = vadd.f32 %v424_v59, %v422_v60 }
 0x3ef   :  { %v426_v63 = vmax.f32 %v425_v62, 0.0  ;;  %v501_v4 = vmul.f32 0.9, %v425_v62 }
 0x3f1   :  { %v427_v2 = vmul.f32 0.3, %v426_v63 }
 0x3f3   :  { %v2044_v3 = vmul.f32 %v427_v2, %v426_v63 }
 0x3f5   :  { %1258 = vmatmul.mubr.f32.vlgmr.msra.gmra.mrb[2].mxu0 %v2044_v3 }
 0x3f6   :  { %1555 = vmatpush3.bf16.msra.mxu0 %v1915_v5  ;;  %1327 = vmatprep.mubr.msk.f32.mxu0 %vm1792_vm0, %v1793_v1 }
 0x3f7   :  { %1556 = vmatprep.subr.bf16.mxu0 %v1791_v0 }
 0x3fa   :  { %1558 = vmatpush3.bf16.msra.mxu0 %v1918_v7 }
 0x3fb   :  { %1559 = vmatprep.subr.bf16.mxu0 %v1791_v0 }
 0x3fe   :  { %1561 = vmatpush3.bf16.msra.mxu0 %v1924_v10 }
 0x3ff   :  { %1562 = vmatprep.subr.bf16.mxu0 %v1791_v0 }
 0x402   :  { %1564 = vmatpush3.bf16.msra.mxu0 %v1930_v13 }
 0x403   :  { %1565 = vmatprep.subr.bf16.mxu0 %v1791_v0 }
 0x406   :  { %1567 = vmatpush3.bf16.msra.mxu0 %v1936_v16 }
 0x407   :  { %1568 = vmatprep.subr.bf16.mxu0 %v1791_v0 }
 0x40a   :  { %1570 = vmatpush3.bf16.msra.mxu0 %v1942_v19 }
 0x40b   :  { %1571 = vmatprep.subr.bf16.mxu0 %v1791_v0 }
 0x40e   :  { %1573 = vmatpush3.bf16.msra.mxu0 %v1948_v24 }
 0x40f   :  { %1574 = vmatprep.subr.bf16.mxu0 %v1791_v0 }
 0x412   :  { %1576 = vmatpush3.bf16.msra.mxu0 %v1954_v28 }
 0x4c8   :  { %v497_v6 = vpop.f32.mrb[2].mxu0 }
 0x4c9   :  { %v502_v9 = vadd.f32 %v501_v4, %v497_v6  ;;  %v1259_v11 = vpop.f32.mrb[3].mxu0 }
 0x4cb   :  { %v505_v12 = vadd.f32 %v504_v8, %v502_v9  ;;  %v744_v8 = vld [vmem:[#allocation5 + $0x38] sm:$0xff] }
 0x4cd   :  { %v506_v14 = vmax.f32 %v505_v12, 0.0 }
 0x4cf   :  { %v507_v15 = vmul.f32 0.3, %v506_v14 }
 0x4d1   :  { %v2064_v17 = vmul.f32 %v507_v15, %v506_v14 }
 0x4d3   :  { %1293 = vmatmul.mubr.f32.vlgmr.msra.gmra.mrb[6].mxu1 %v2064_v17 }
 0x4d4   :  { %1579 = vmatpush3.bf16.msra.mxu1 %v1915_v5  ;;  %1362 = vmatprep.mubr.msk.f32.mxu1 %vm1792_vm0, %v1793_v1  ;;  %v761_v1 = vld [vmem:[#allocation10] sm:$0xff]  ;;  %v762_v5 = vld [vmem:[#allocation10 + $0x8] sm:$0xff] }
 0x4d5   :  { %1580 = vmatprep.subr.bf16.mxu1 %v1791_v0 }
 0x4d8   :  { %1582 = vmatpush3.bf16.msra.mxu1 %v1918_v7  ;;  %v1601_v7 = vpack.c.bf16 %v762_v5, %v761_v1 }
 0x4d9   :  { %1583 = vmatprep.subr.bf16.mxu1 %v1791_v0 }
 0x4da   :  { %1602 = vmatprep.subr.bf16.mxu0 %v1601_v7 }
 0x4dc   :  { %1585 = vmatpush3.bf16.msra.mxu1 %v1924_v10  ;;  %v581_v10 = vmul.f32 0.9, %v505_v12 }
 0x4dd   :  { %1586 = vmatprep.subr.bf16.mxu1 %v1791_v0 }
 0x4e0   :  { %1588 = vmatpush3.bf16.msra.mxu1 %v1930_v13 }
 0x4e1   :  { %1589 = vmatprep.subr.bf16.mxu1 %v1791_v0 }
 0x4e4   :  { %1591 = vmatpush3.bf16.msra.mxu1 %v1936_v16 }
 0x4e5   :  { %1592 = vmatprep.subr.bf16.mxu1 %v1791_v0 }
 0x4e8   :  { %1594 = vmatpush3.bf16.msra.mxu1 %v1942_v19  ;;  %v763_v19 = vld [vmem:[#allocation10 + $0x10] sm:$0xff] }
 0x4e9   :  { %1595 = vmatprep.subr.bf16.mxu1 %v1791_v0 }
 0x4ec   :  { %1597 = vmatpush3.bf16.msra.mxu1 %v1948_v24  ;;  %v1605_v24 = vpack.c.bf16 %v764_v23, %v763_v19 }
 0x4ed   :  { %1598 = vmatprep.subr.bf16.mxu1 %v1791_v0  ;;  %v766_v0 = vld [vmem:[#allocation10 + $0x28] sm:$0xff] }
 0x4f0   :  { %1600 = vmatpush3.bf16.msra.mxu1 %v1954_v28  ;;  %v1609_v28 = vpack.c.bf16 %v766_v0, %v765_v27 }
 0x5a6   :  { %v577_v13 = vpop.f32.mrb[6].mxu1 }
 0x5a7   :  { %v582_v16 = vadd.f32 %v581_v10, %v577_v13  ;;  %v1294_v20 = vpop.f32.mrb[7].mxu1 }
 0x5a9   :  { %v585_v21 = vadd.f32 %v584_v18, %v582_v16 }
 0x5ab   :  { %v586_v22 = vmax.f32 %v585_v21, 0.0  ;;  %v661_v44 = vmul.f32 0.9, %v585_v21 }
 0x5ad   :  { %v587_v25 = vmul.f32 0.3, %v586_v22 }
 0x5af   :  { %v588_v26 = vmul.f32 %v587_v25, %v586_v22 }
 0x5b1   :  { %1328 = vmatmul.mubr.f32.vlgmr.msra.gmra.mrb[4].mxu0 %v588_v26 }
 0x5b2   :  { %1604 = vmatpush3.bf16.msra.mxu0 %v1601_v7  ;;  %1397 = vmatprep.mubr.f32.mxu0 %v1981_v38  ;;  %v1625_v38 = vpack.c.bf16 %v774_v40, %v773_v39 }
 0x5b3   :  { %1606 = vmatprep.subr.bf16.mxu0 %v1605_v24 }
 0x5b6   :  { %1608 = vmatpush3.bf16.msra.mxu0 %v1605_v24 }
 0x5b7   :  { %1610 = vmatprep.subr.bf16.mxu0 %v1609_v28 }
 0x5ba   :  { %1612 = vmatpush3.bf16.msra.mxu0 %v1609_v28 }
 0x5bb   :  { %1614 = vmatprep.subr.bf16.mxu0 %v1613_v31 }
 0x5be   :  { %1616 = vmatpush3.bf16.msra.mxu0 %v1613_v31 }
 0x5bf   :  { %1618 = vmatprep.subr.bf16.mxu0 %v1617_v34 }
 0x5c2   :  { %1620 = vmatpush3.bf16.msra.mxu0 %v1617_v34 }
 0x5c3   :  { %1622 = vmatprep.subr.bf16.mxu0 %v1621_v37 }
 0x5c6   :  { %1624 = vmatpush3.bf16.msra.mxu0 %v1621_v37 }
 0x5c7   :  { %1626 = vmatprep.subr.bf16.mxu0 %v1625_v38 }
 0x5ca   :  { %1628 = vmatpush3.bf16.msra.mxu0 %v1625_v38 }
 0x5cb   :  { %1630 = vmatprep.subr.bf16.mxu0 %v1629_v43 }
 0x5ce   :  { %1632 = vmatpush3.bf16.msra.mxu0 %v1629_v43 }
 0x5d1   :  { %1398 = vmatmul.mubr.f32.vlgmr.msra.gmra.mrb[6].mxu0 %v2002_v47 }
 0x5d2   :  { %1400 = vmatprep.mubr.f32.mxu0 %v2023_v56 }
 0x5d5   :  { %1401 = vmatmul.mubr.f32.gmra.mrb[8].mxu0 %v2044_v3 }
 0x5d6   :  { %1403 = vmatprep.mubr.f32.mxu0 %v2064_v17 }
 0x5d9   :  { %1404 = vmatmul.mubr.f32.gmra.mrb[10].mxu0 %v588_v26 }
 0x684   :  { %v657_v45 = vpop.f32.mrb[4].mxu0 }
 0x685   :  { %v662_v48 = vadd.f32 %v661_v44, %v657_v45  ;;  %v1329_v49 = vpop.f32.mrb[5].mxu0 }
 0x687   :  { %v665_v50 = vadd.f32 %v664_v46, %v662_v48 }
 0x689   :  { %v666_v51 = vmax.f32 %v665_v50, 0.0  ;;  %v741_v4 = vmul.f32 0.9, %v665_v50 }
 0x68b   :  { %v667_v52 = vmul.f32 0.3, %v666_v51 }
 0x68d   :  { %v668_v53 = vmul.f32 %v667_v52, %v666_v51 }
 0x68f   :  { %1363 = vmatmul.mubr.f32.vlgmr.msra.gmra.mrb[8].mxu1 %v668_v53  ;;  %1406 = vmatprep.mubr.f32.mxu0 %v668_v53 }
 0x6a4   :  { %v1399_v47 = vpop.f32.mrb[6].mxu0 }
 0x6a5   :  { %v890_v55 = vadd.f32 %v1399_v47, %v924_v54  ;;  %v843_v56 = vpop.f32.mrb[7].mxu0 }
 0x6a6   :  { %v889_v57 = vadd.f32 %v924_v54, %v843_v56 }
 0x6a7   :  { %898 = vst [vmem:[#allocation14 + $0x8] sm:$0xff] %v890_v55 }
 0x6a8   :  { %897 = vst [vmem:[#allocation14] sm:$0xff] %v889_v57  ;;  %v1402_v58 = vpop.f32.mrb[8].mxu0 }
 0x6a9   :  { %v892_v59 = vadd.f32 %v1402_v58, %v924_v54  ;;  %v853_v60 = vpop.f32.mrb[9].mxu0 }
 0x6aa   :  { %v891_v61 = vadd.f32 %v924_v54, %v853_v60 }
 0x6ab   :  { %900 = vst [vmem:[#allocation14 + $0x18] sm:$0xff] %v892_v59 }
 0x6ac   :  { %899 = vst [vmem:[#allocation14 + $0x10] sm:$0xff] %v891_v61  ;;  %v1405_v62 = vpop.f32.mrb[10].mxu0 }
 0x6ad   :  { %v894_v63 = vadd.f32 %v1405_v62, %v924_v54  ;;  %v863_v2 = vpop.f32.mrb[11].mxu0 }
 0x6ae   :  { %v893_v3 = vadd.f32 %v924_v54, %v863_v2 }
 0x6af   :  { %902 = vst [vmem:[#allocation14 + $0x28] sm:$0xff] %v894_v63 }
 0x6b0   :  { %901 = vst [vmem:[#allocation14 + $0x20] sm:$0xff] %v893_v3 }
 0x762   :  { %v737_v6 = vpop.f32.mrb[8].mxu1 }
 0x763   :  { %v742_v9 = vadd.f32 %v741_v4, %v737_v6  ;;  %v1364_v11 = vpop.f32.mrb[9].mxu1 }
 0x765   :  { %v745_v12 = vadd.f32 %v744_v8, %v742_v9 }
 0x767   :  { %v746_v14 = vmax.f32 %v745_v12, 0.0 }
 0x769   :  { %v747_v15 = vmul.f32 0.3, %v746_v14 }
 0x76b   :  { %v748_v17 = vmul.f32 %v747_v15, %v746_v14 }
 0x76d   :  { %1407 = vmatmul.mubr.f32.gmra.mrb[12].mxu0 %v748_v17 }
 0x840   :  { %v1408_v1 = vpop.f32.mrb[12].mxu0 }
 0x841   :  { %v896_v5 = vadd.f32 %v1408_v1, %v924_v54  ;;  %v873_v7 = vpop.f32.mrb[13].mxu0 }
 0x842   :  { %v895_v10 = vadd.f32 %v924_v54, %v873_v7 }
 0x843   :  { %904 = vst [vmem:[#allocation14 + $0x38] sm:$0xff] %v896_v5 }
 0x844   :  { %903 = vst [vmem:[#allocation14 + $0x30] sm:$0xff] %v895_v10 }
 0x845   :  { %1765 = shalt.err (!%p1762_p2)
}
 0x846   :  { %s1766_s8 = scalar_lea.hbm %s2109_s5, 1024 }
 0x847   :  { %p1767_p3 = scmp.ne.s32.totalorder %s2109_s5, %s1766_s8  ;;  %p1770_p4 = scmp.lt.u32.totalorder %s1766_s8, %s2109_s5 }
 0x849   :  { %p1772_p5 = pnand %p1770_p4, %p1767_p3 }
 0x84b   :  { %1775 = shalt.err (!%p1772_p5)
}
 0x84c   :  { %916 = dma.vmem_to_hbm [thread:$0]  %s911_s29, 1024, %s2109_s5, [#allocation7], %s1786_s30, %s1786_s30, %s1787_s6  }
 0x84d   :  { %1782 = dma.done.wait [#allocation7], 1024  }
 0x84e   :  { %1783 = vsyncadd [#allocation7], 4294966272 }
 0x84f   :  { %920 = vsyncpa [#allocation6], 1 }
 0x850   :  { %921 = vsyncpa [#allocation9], 1 }
 0x851   :  { %922 = vsyncpa [#allocation12], 1 }
 0x852   :  { %923 = vsyncpa [#allocation7], 1 }

</bundles_post_ra>
